<compile_context>
chip_gen: v5e
topology: v5e:2x2
jax: 0.10.0
libtpu: 0.0.40
codegen_flags: <defaults>
</compile_context>

<pallas_src>
import jax
import jax.numpy as jnp
from jax.experimental import pallas as pl
from jax.experimental.pallas import tpu as pltpu


def encoder_kernel(x_ref, wemb_ref, bemb_ref, wih_ref, bias_ref, whh_ref,
                   out_ref, gx_ref):
    """Single invocation: whole sequence in VMEM, in-kernel unrolled recurrence.

    x_ref:    (T*B, 2)     flattened obs_traj
    wemb_ref: (2, E)       spatial_embedding weight (transposed)
    bemb_ref: (1, E)       spatial_embedding bias
    wih_ref:  (E, 4H)      LSTM W_ih^T, gate columns [i|f|o|g]
    bias_ref: (1, 4H)      b_ih + b_hh, gate columns [i|f|o|g]
    whh_ref:  (H, 4H)      LSTM W_hh^T, gate columns [i|f|o|g]
    out_ref:  (1, B, H)    final hidden state
    gx_ref:   (T*B, 4H)    VMEM scratch for the hoisted input projection
    """
    TB = x_ref.shape[0]
    H = whh_ref.shape[0]
    B = out_ref.shape[1]
    T = TB // B

    # ---- time-parallel input projection (hoisted out of the recurrence) ----
    x = x_ref[...]                                            # (T*B, 2)
    # spatial_embedding with K=2: two VPU FMAs instead of a wasted MXU pass.
    emb = (x[:, 0:1] * wemb_ref[0:1, :]
           + x[:, 1:2] * wemb_ref[1:2, :]
           + bemb_ref[...])                                   # (T*B, E)
    # One batched MXU matmul for all time steps; biases pre-fused.
    gx_ref[...] = (jnp.dot(emb, wih_ref[...],
                           preferred_element_type=jnp.float32)
                   + bias_ref[...])                           # (T*B, 4H)

    whh = whh_ref[...]                                        # (H, 4H)

    # ---- sequential LSTM recurrence; only h @ W_hh on the critical path ----
    def step(t, carry):
        h, c = carry
        row = pl.multiple_of(t * B, B)
        gates = gx_ref[pl.ds(row, B), :] + jnp.dot(
            h, whh, preferred_element_type=jnp.float32)       # (B, 4H)
        # gate columns are [i | f | o | g]: one sigmoid over 3H, one tanh over H
        sig = jax.nn.sigmoid(gates[:, :3 * H])
        i_g = sig[:, 0 * H:1 * H]
        f_g = sig[:, 1 * H:2 * H]
        o_g = sig[:, 2 * H:3 * H]
        g_g = jnp.tanh(gates[:, 3 * H:])
        c_new = f_g * c + i_g * g_g
        h_new = o_g * jnp.tanh(c_new)
        return h_new, c_new

    h0 = jnp.zeros((B, H), jnp.float32)
    c0 = jnp.zeros((B, H), jnp.float32)
    h_final, _ = jax.lax.fori_loop(0, T, step, (h0, c0), unroll=True)

    out_ref[0] = h_final                                      # final_h[0]


def encoder_forward(obs_traj, params):
    """obs_traj: (T, B, 2) f32 -> final_h: (1, B, H) f32."""
    T, B, _ = obs_traj.shape
    w_emb, b_emb, w_ih, b_ih, w_hh, b_hh = params
    H = w_hh.shape[0]

    # Fuse the two LSTM biases and reorder gate columns [i,f,g,o] -> [i,f,o,g]
    # so the kernel can apply a single sigmoid over the first 3H columns.
    def reorder(a):
        i_c, f_c, g_c, o_c = jnp.split(a, 4, axis=-1)
        return jnp.concatenate([i_c, f_c, o_c, g_c], axis=-1)

    w_ih_k = reorder(w_ih)
    w_hh_k = reorder(w_hh)
    bias_k = reorder(b_ih + b_hh)

    x2 = obs_traj.reshape(T * B, 2)                           # flatten time into rows

    vmem_spec = lambda: pl.BlockSpec(memory_space=pltpu.MemorySpace.VMEM)

    return pl.pallas_call(
        encoder_kernel,
        out_shape=jax.ShapeDtypeStruct((1, B, H), jnp.float32),
        in_specs=[vmem_spec() for _ in range(6)],
        out_specs=vmem_spec(),
        scratch_shapes=[pltpu.VMEM((T * B, 4 * H), jnp.float32)],
    )(x2, w_emb, b_emb, w_ih_k, bias_k, w_hh_k)


def make_params(key, embedding_dim=64, h_dim=64):
    """Deterministic synthetic parameters (PyTorch-style uniform init).

    Stored pre-transposed vs PyTorch ((in, out) / (in, 4H)), gate order [i,f,g,o].
    """
    ks = jax.random.split(key, 6)
    k_emb = 1.0 / jnp.sqrt(2.0)
    k_lstm = 1.0 / jnp.sqrt(float(h_dim))
    w_emb = jax.random.uniform(ks[0], (2, embedding_dim), jnp.float32, -k_emb, k_emb)
    b_emb = jax.random.uniform(ks[1], (1, embedding_dim), jnp.float32, -k_emb, k_emb)
    w_ih = jax.random.uniform(ks[2], (embedding_dim, 4 * h_dim), jnp.float32, -k_lstm, k_lstm)
    b_ih = jax.random.uniform(ks[3], (1, 4 * h_dim), jnp.float32, -k_lstm, k_lstm)
    w_hh = jax.random.uniform(ks[4], (h_dim, 4 * h_dim), jnp.float32, -k_lstm, k_lstm)
    b_hh = jax.random.uniform(ks[5], (1, 4 * h_dim), jnp.float32, -k_lstm, k_lstm)
    return (w_emb, b_emb, w_ih, b_ih, w_hh, b_hh)


def encoder_reference(obs_traj, params):
    """Pure-JAX reference mirroring the PyTorch module semantics."""
    w_emb, b_emb, w_ih, b_ih, w_hh, b_hh = params
    T, B, _ = obs_traj.shape
    H = w_hh.shape[0]
    emb = obs_traj.reshape(-1, 2) @ w_emb + b_emb
    emb = emb.reshape(T, B, -1)
    h = jnp.zeros((B, H), jnp.float32)
    c = jnp.zeros((B, H), jnp.float32)
    for t in range(T):
        gates = emb[t] @ w_ih + b_ih + h @ w_hh + b_hh
        i_g = jax.nn.sigmoid(gates[:, 0 * H:1 * H])
        f_g = jax.nn.sigmoid(gates[:, 1 * H:2 * H])
        g_g = jnp.tanh(gates[:, 2 * H:3 * H])
        o_g = jax.nn.sigmoid(gates[:, 3 * H:4 * H])
        c = f_g * c + i_g * g_g
        h = o_g * jnp.tanh(c)
    return h[None]


if __name__ == "__main__":
    obs_len, batch = 8, 8
    embedding_dim, h_dim = 64, 64

    key = jax.random.PRNGKey(0)
    k_x, k_p = jax.random.split(key)
    obs_traj = jax.random.normal(k_x, (obs_len, batch, 2), jnp.float32)
    params = make_params(k_p, embedding_dim, h_dim)

    final_h = encoder_forward(obs_traj, params)
    final_h = jax.block_until_ready(final_h)

    ref = encoder_reference(obs_traj, params)
    assert final_h.shape == (1, batch, h_dim)
    assert jnp.allclose(final_h, ref, atol=1e-5, rtol=1e-5)

    print("KERNEL_OK")
</pallas_src>

<mosaic_0001>
module attributes {stable_mosaic.version = 11 : i64} {
  func.func @encoder_kernel(%arg0: memref<64x2xf32, #tpu.memory_space<vmem>>, %arg1: memref<2x64xf32, #tpu.memory_space<vmem>>, %arg2: memref<1x64xf32, #tpu.memory_space<vmem>>, %arg3: memref<64x256xf32, #tpu.memory_space<vmem>>, %arg4: memref<1x256xf32, #tpu.memory_space<vmem>>, %arg5: memref<64x256xf32, #tpu.memory_space<vmem>>, %arg6: memref<1x8x64xf32, #tpu.memory_space<vmem>>, %arg7: memref<64x256xf32, #tpu.memory_space<vmem>>) attributes {dimension_semantics = [], scalar_prefetch = 0 : i64, scratch_operands = 1 : i64, tpu.core_type = #tpu.core_type<tc>} {
    %c0 = arith.constant 0 : index
    %c0_0 = arith.constant 0 : index
    %0 = vector.load %arg0[%c0, %c0_0] : memref<64x2xf32, #tpu.memory_space<vmem>>, vector<64x2xf32>
    %1 = vector.extract_strided_slice %0 {offsets = [0, 0], sizes = [64, 1], strides = [1, 1]} : vector<64x2xf32> to vector<64x1xf32>
    %c0_1 = arith.constant 0 : index
    %c0_2 = arith.constant 0 : index
    %2 = vector.load %arg1[%c0_1, %c0_2] : memref<2x64xf32, #tpu.memory_space<vmem>>, vector<1x64xf32>
    %3 = vector.broadcast %1 : vector<64x1xf32> to vector<64x64xf32>
    %4 = vector.broadcast %2 : vector<1x64xf32> to vector<64x64xf32>
    %5 = arith.mulf %3, %4 : vector<64x64xf32>
    %6 = vector.extract_strided_slice %0 {offsets = [0, 1], sizes = [64, 1], strides = [1, 1]} : vector<64x2xf32> to vector<64x1xf32>
    %c1 = arith.constant 1 : index
    %c0_3 = arith.constant 0 : index
    %7 = vector.load %arg1[%c1, %c0_3] : memref<2x64xf32, #tpu.memory_space<vmem>>, vector<1x64xf32>
    %8 = vector.broadcast %6 : vector<64x1xf32> to vector<64x64xf32>
    %9 = vector.broadcast %7 : vector<1x64xf32> to vector<64x64xf32>
    %10 = arith.mulf %8, %9 : vector<64x64xf32>
    %11 = arith.addf %5, %10 : vector<64x64xf32>
    %c0_4 = arith.constant 0 : index
    %c0_5 = arith.constant 0 : index
    %12 = vector.load %arg2[%c0_4, %c0_5] : memref<1x64xf32, #tpu.memory_space<vmem>>, vector<1x64xf32>
    %13 = vector.broadcast %12 : vector<1x64xf32> to vector<64x64xf32>
    %14 = arith.addf %11, %13 : vector<64x64xf32>
    %c0_6 = arith.constant 0 : index
    %c0_7 = arith.constant 0 : index
    %15 = vector.load %arg3[%c0_6, %c0_7] : memref<64x256xf32, #tpu.memory_space<vmem>>, vector<64x256xf32>
    %cst = arith.constant dense<0.000000e+00> : vector<64x256xf32>
    %16 = tpu.matmul %14, %15, %cst {dimension_numbers = #tpu.dot_dimension_numbers<[1], [0], [0], [1], [0, 0, 1, 1], [], []>} : vector<64x64xf32>, vector<64x256xf32>, vector<64x256xf32> -> vector<64x256xf32>
    %c0_8 = arith.constant 0 : index
    %c0_9 = arith.constant 0 : index
    %17 = vector.load %arg4[%c0_8, %c0_9] : memref<1x256xf32, #tpu.memory_space<vmem>>, vector<1x256xf32>
    %18 = vector.broadcast %17 : vector<1x256xf32> to vector<64x256xf32>
    %19 = arith.addf %16, %18 : vector<64x256xf32>
    %c0_10 = arith.constant 0 : index
    %c0_11 = arith.constant 0 : index
    %20 = vector.load %arg7[%c0_10, %c0_11] : memref<64x256xf32, #tpu.memory_space<vmem>>, vector<64x256xf32>
    tpu.vector_store %arg7[%c0_10, %c0_11], %19 {strides = array<i32>} : memref<64x256xf32, #tpu.memory_space<vmem>>, vector<64x256xf32>,
    %c0_12 = arith.constant 0 : index
    %c0_13 = arith.constant 0 : index
    %21 = vector.load %arg5[%c0_12, %c0_13] : memref<64x256xf32, #tpu.memory_space<vmem>>, vector<64x256xf32>
    %cst_14 = arith.constant 0.000000e+00 : f32
    %22 = vector.broadcast %cst_14 : f32 to vector<8x64xf32>
    %cst_15 = arith.constant 0.000000e+00 : f32
    %23 = vector.broadcast %cst_15 : f32 to vector<8x64xf32>
    %c0_i32 = arith.constant 0 : i32
    %c8_i32 = arith.constant 8 : i32
    %24 = arith.muli %c0_i32, %c8_i32 : i32
    %25 = tpu.assume_multiple %24, 8 : i32
    %26 = arith.index_cast %25 : i32 to index
    %c0_16 = arith.constant 0 : index
    %27 = vector.load %arg7[%26, %c0_16] : memref<64x256xf32, #tpu.memory_space<vmem>>, vector<8x256xf32>
    %cst_17 = arith.constant dense<0.000000e+00> : vector<8x256xf32>
    %28 = tpu.matmul %22, %21, %cst_17 {dimension_numbers = #tpu.dot_dimension_numbers<[1], [0], [0], [1], [0, 0, 1, 1], [], []>} : vector<8x64xf32>, vector<64x256xf32>, vector<8x256xf32> -> vector<8x256xf32>
    %29 = arith.addf %27, %28 : vector<8x256xf32>
    %30 = vector.extract_strided_slice %29 {offsets = [0, 0], sizes = [8, 192], strides = [1, 1]} : vector<8x256xf32> to vector<8x192xf32>
    %31 = arith.negf %30 : vector<8x192xf32>
    %32 = math.exp %31 : vector<8x192xf32>
    %cst_18 = arith.constant 1.000000e+00 : f32
    %33 = vector.broadcast %cst_18 : f32 to vector<8x192xf32>
    %34 = arith.addf %33, %32 : vector<8x192xf32>
    %35 = arith.divf %33, %34 : vector<8x192xf32>
    %36 = vector.extract_strided_slice %35 {offsets = [0, 0], sizes = [8, 64], strides = [1, 1]} : vector<8x192xf32> to vector<8x64xf32>
    %37 = vector.extract_strided_slice %35 {offsets = [0, 64], sizes = [8, 64], strides = [1, 1]} : vector<8x192xf32> to vector<8x64xf32>
    %38 = vector.extract_strided_slice %35 {offsets = [0, 128], sizes = [8, 64], strides = [1, 1]} : vector<8x192xf32> to vector<8x64xf32>
    %39 = vector.extract_strided_slice %29 {offsets = [0, 192], sizes = [8, 64], strides = [1, 1]} : vector<8x256xf32> to vector<8x64xf32>
    %40 = math.tanh %39 : vector<8x64xf32>
    %41 = arith.mulf %37, %23 : vector<8x64xf32>
    %42 = arith.mulf %36, %40 : vector<8x64xf32>
    %43 = arith.addf %41, %42 : vector<8x64xf32>
    %44 = math.tanh %43 : vector<8x64xf32>
    %45 = arith.mulf %38, %44 : vector<8x64xf32>
    %c1_i32 = arith.constant 1 : i32
    %c8_i32_19 = arith.constant 8 : i32
    %46 = arith.muli %c1_i32, %c8_i32_19 : i32
    %47 = tpu.assume_multiple %46, 8 : i32
    %48 = arith.index_cast %47 : i32 to index
    %c0_20 = arith.constant 0 : index
    %49 = vector.load %arg7[%48, %c0_20] : memref<64x256xf32, #tpu.memory_space<vmem>>, vector<8x256xf32>
    %cst_21 = arith.constant dense<0.000000e+00> : vector<8x256xf32>
    %50 = tpu.matmul %45, %21, %cst_21 {dimension_numbers = #tpu.dot_dimension_numbers<[1], [0], [0], [1], [0, 0, 1, 1], [], []>} : vector<8x64xf32>, vector<64x256xf32>, vector<8x256xf32> -> vector<8x256xf32>
    %51 = arith.addf %49, %50 : vector<8x256xf32>
    %52 = vector.extract_strided_slice %51 {offsets = [0, 0], sizes = [8, 192], strides = [1, 1]} : vector<8x256xf32> to vector<8x192xf32>
    %53 = arith.negf %52 : vector<8x192xf32>
    %54 = math.exp %53 : vector<8x192xf32>
    %cst_22 = arith.constant 1.000000e+00 : f32
    %55 = vector.broadcast %cst_22 : f32 to vector<8x192xf32>
    %56 = arith.addf %55, %54 : vector<8x192xf32>
    %57 = arith.divf %55, %56 : vector<8x192xf32>
    %58 = vector.extract_strided_slice %57 {offsets = [0, 0], sizes = [8, 64], strides = [1, 1]} : vector<8x192xf32> to vector<8x64xf32>
    %59 = vector.extract_strided_slice %57 {offsets = [0, 64], sizes = [8, 64], strides = [1, 1]} : vector<8x192xf32> to vector<8x64xf32>
    %60 = vector.extract_strided_slice %57 {offsets = [0, 128], sizes = [8, 64], strides = [1, 1]} : vector<8x192xf32> to vector<8x64xf32>
    %61 = vector.extract_strided_slice %51 {offsets = [0, 192], sizes = [8, 64], strides = [1, 1]} : vector<8x256xf32> to vector<8x64xf32>
    %62 = math.tanh %61 : vector<8x64xf32>
    %63 = arith.mulf %59, %43 : vector<8x64xf32>
    %64 = arith.mulf %58, %62 : vector<8x64xf32>
    %65 = arith.addf %63, %64 : vector<8x64xf32>
    %66 = math.tanh %65 : vector<8x64xf32>
    %67 = arith.mulf %60, %66 : vector<8x64xf32>
    %c2_i32 = arith.constant 2 : i32
    %c8_i32_23 = arith.constant 8 : i32
    %68 = arith.muli %c2_i32, %c8_i32_23 : i32
    %69 = tpu.assume_multiple %68, 8 : i32
    %70 = arith.index_cast %69 : i32 to index
    %c0_24 = arith.constant 0 : index
    %71 = vector.load %arg7[%70, %c0_24] : memref<64x256xf32, #tpu.memory_space<vmem>>, vector<8x256xf32>
    %cst_25 = arith.constant dense<0.000000e+00> : vector<8x256xf32>
    %72 = tpu.matmul %67, %21, %cst_25 {dimension_numbers = #tpu.dot_dimension_numbers<[1], [0], [0], [1], [0, 0, 1, 1], [], []>} : vector<8x64xf32>, vector<64x256xf32>, vector<8x256xf32> -> vector<8x256xf32>
    %73 = arith.addf %71, %72 : vector<8x256xf32>
    %74 = vector.extract_strided_slice %73 {offsets = [0, 0], sizes = [8, 192], strides = [1, 1]} : vector<8x256xf32> to vector<8x192xf32>
    %75 = arith.negf %74 : vector<8x192xf32>
    %76 = math.exp %75 : vector<8x192xf32>
    %cst_26 = arith.constant 1.000000e+00 : f32
    %77 = vector.broadcast %cst_26 : f32 to vector<8x192xf32>
    %78 = arith.addf %77, %76 : vector<8x192xf32>
    %79 = arith.divf %77, %78 : vector<8x192xf32>
    %80 = vector.extract_strided_slice %79 {offsets = [0, 0], sizes = [8, 64], strides = [1, 1]} : vector<8x192xf32> to vector<8x64xf32>
    %81 = vector.extract_strided_slice %79 {offsets = [0, 64], sizes = [8, 64], strides = [1, 1]} : vector<8x192xf32> to vector<8x64xf32>
    %82 = vector.extract_strided_slice %79 {offsets = [0, 128], sizes = [8, 64], strides = [1, 1]} : vector<8x192xf32> to vector<8x64xf32>
    %83 = vector.extract_strided_slice %73 {offsets = [0, 192], sizes = [8, 64], strides = [1, 1]} : vector<8x256xf32> to vector<8x64xf32>
    %84 = math.tanh %83 : vector<8x64xf32>
    %85 = arith.mulf %81, %65 : vector<8x64xf32>
    %86 = arith.mulf %80, %84 : vector<8x64xf32>
    %87 = arith.addf %85, %86 : vector<8x64xf32>
    %88 = math.tanh %87 : vector<8x64xf32>
    %89 = arith.mulf %82, %88 : vector<8x64xf32>
    %c3_i32 = arith.constant 3 : i32
    %c8_i32_27 = arith.constant 8 : i32
    %90 = arith.muli %c3_i32, %c8_i32_27 : i32
    %91 = tpu.assume_multiple %90, 8 : i32
    %92 = arith.index_cast %91 : i32 to index
    %c0_28 = arith.constant 0 : index
    %93 = vector.load %arg7[%92, %c0_28] : memref<64x256xf32, #tpu.memory_space<vmem>>, vector<8x256xf32>
    %cst_29 = arith.constant dense<0.000000e+00> : vector<8x256xf32>
    %94 = tpu.matmul %89, %21, %cst_29 {dimension_numbers = #tpu.dot_dimension_numbers<[1], [0], [0], [1], [0, 0, 1, 1], [], []>} : vector<8x64xf32>, vector<64x256xf32>, vector<8x256xf32> -> vector<8x256xf32>
    %95 = arith.addf %93, %94 : vector<8x256xf32>
    %96 = vector.extract_strided_slice %95 {offsets = [0, 0], sizes = [8, 192], strides = [1, 1]} : vector<8x256xf32> to vector<8x192xf32>
    %97 = arith.negf %96 : vector<8x192xf32>
    %98 = math.exp %97 : vector<8x192xf32>
    %cst_30 = arith.constant 1.000000e+00 : f32
    %99 = vector.broadcast %cst_30 : f32 to vector<8x192xf32>
    %100 = arith.addf %99, %98 : vector<8x192xf32>
    %101 = arith.divf %99, %100 : vector<8x192xf32>
    %102 = vector.extract_strided_slice %101 {offsets = [0, 0], sizes = [8, 64], strides = [1, 1]} : vector<8x192xf32> to vector<8x64xf32>
    %103 = vector.extract_strided_slice %101 {offsets = [0, 64], sizes = [8, 64], strides = [1, 1]} : vector<8x192xf32> to vector<8x64xf32>
    %104 = vector.extract_strided_slice %101 {offsets = [0, 128], sizes = [8, 64], strides = [1, 1]} : vector<8x192xf32> to vector<8x64xf32>
    %105 = vector.extract_strided_slice %95 {offsets = [0, 192], sizes = [8, 64], strides = [1, 1]} : vector<8x256xf32> to vector<8x64xf32>
    %106 = math.tanh %105 : vector<8x64xf32>
    %107 = arith.mulf %103, %87 : vector<8x64xf32>
    %108 = arith.mulf %102, %106 : vector<8x64xf32>
    %109 = arith.addf %107, %108 : vector<8x64xf32>
    %110 = math.tanh %109 : vector<8x64xf32>
    %111 = arith.mulf %104, %110 : vector<8x64xf32>
    %c4_i32 = arith.constant 4 : i32
    %c8_i32_31 = arith.constant 8 : i32
    %112 = arith.muli %c4_i32, %c8_i32_31 : i32
    %113 = tpu.assume_multiple %112, 8 : i32
    %114 = arith.index_cast %113 : i32 to index
    %c0_32 = arith.constant 0 : index
    %115 = vector.load %arg7[%114, %c0_32] : memref<64x256xf32, #tpu.memory_space<vmem>>, vector<8x256xf32>
    %cst_33 = arith.constant dense<0.000000e+00> : vector<8x256xf32>
    %116 = tpu.matmul %111, %21, %cst_33 {dimension_numbers = #tpu.dot_dimension_numbers<[1], [0], [0], [1], [0, 0, 1, 1], [], []>} : vector<8x64xf32>, vector<64x256xf32>, vector<8x256xf32> -> vector<8x256xf32>
    %117 = arith.addf %115, %116 : vector<8x256xf32>
    %118 = vector.extract_strided_slice %117 {offsets = [0, 0], sizes = [8, 192], strides = [1, 1]} : vector<8x256xf32> to vector<8x192xf32>
    %119 = arith.negf %118 : vector<8x192xf32>
    %120 = math.exp %119 : vector<8x192xf32>
    %cst_34 = arith.constant 1.000000e+00 : f32
    %121 = vector.broadcast %cst_34 : f32 to vector<8x192xf32>
    %122 = arith.addf %121, %120 : vector<8x192xf32>
    %123 = arith.divf %121, %122 : vector<8x192xf32>
    %124 = vector.extract_strided_slice %123 {offsets = [0, 0], sizes = [8, 64], strides = [1, 1]} : vector<8x192xf32> to vector<8x64xf32>
    %125 = vector.extract_strided_slice %123 {offsets = [0, 64], sizes = [8, 64], strides = [1, 1]} : vector<8x192xf32> to vector<8x64xf32>
    %126 = vector.extract_strided_slice %123 {offsets = [0, 128], sizes = [8, 64], strides = [1, 1]} : vector<8x192xf32> to vector<8x64xf32>
    %127 = vector.extract_strided_slice %117 {offsets = [0, 192], sizes = [8, 64], strides = [1, 1]} : vector<8x256xf32> to vector<8x64xf32>
    %128 = math.tanh %127 : vector<8x64xf32>
    %129 = arith.mulf %125, %109 : vector<8x64xf32>
    %130 = arith.mulf %124, %128 : vector<8x64xf32>
    %131 = arith.addf %129, %130 : vector<8x64xf32>
    %132 = math.tanh %131 : vector<8x64xf32>
    %133 = arith.mulf %126, %132 : vector<8x64xf32>
    %c5_i32 = arith.constant 5 : i32
    %c8_i32_35 = arith.constant 8 : i32
    %134 = arith.muli %c5_i32, %c8_i32_35 : i32
    %135 = tpu.assume_multiple %134, 8 : i32
    %136 = arith.index_cast %135 : i32 to index
    %c0_36 = arith.constant 0 : index
    %137 = vector.load %arg7[%136, %c0_36] : memref<64x256xf32, #tpu.memory_space<vmem>>, vector<8x256xf32>
    %cst_37 = arith.constant dense<0.000000e+00> : vector<8x256xf32>
    %138 = tpu.matmul %133, %21, %cst_37 {dimension_numbers = #tpu.dot_dimension_numbers<[1], [0], [0], [1], [0, 0, 1, 1], [], []>} : vector<8x64xf32>, vector<64x256xf32>, vector<8x256xf32> -> vector<8x256xf32>
    %139 = arith.addf %137, %138 : vector<8x256xf32>
    %140 = vector.extract_strided_slice %139 {offsets = [0, 0], sizes = [8, 192], strides = [1, 1]} : vector<8x256xf32> to vector<8x192xf32>
    %141 = arith.negf %140 : vector<8x192xf32>
    %142 = math.exp %141 : vector<8x192xf32>
    %cst_38 = arith.constant 1.000000e+00 : f32
    %143 = vector.broadcast %cst_38 : f32 to vector<8x192xf32>
    %144 = arith.addf %143, %142 : vector<8x192xf32>
    %145 = arith.divf %143, %144 : vector<8x192xf32>
    %146 = vector.extract_strided_slice %145 {offsets = [0, 0], sizes = [8, 64], strides = [1, 1]} : vector<8x192xf32> to vector<8x64xf32>
    %147 = vector.extract_strided_slice %145 {offsets = [0, 64], sizes = [8, 64], strides = [1, 1]} : vector<8x192xf32> to vector<8x64xf32>
    %148 = vector.extract_strided_slice %145 {offsets = [0, 128], sizes = [8, 64], strides = [1, 1]} : vector<8x192xf32> to vector<8x64xf32>
    %149 = vector.extract_strided_slice %139 {offsets = [0, 192], sizes = [8, 64], strides = [1, 1]} : vector<8x256xf32> to vector<8x64xf32>
    %150 = math.tanh %149 : vector<8x64xf32>
    %151 = arith.mulf %147, %131 : vector<8x64xf32>
    %152 = arith.mulf %146, %150 : vector<8x64xf32>
    %153 = arith.addf %151, %152 : vector<8x64xf32>
    %154 = math.tanh %153 : vector<8x64xf32>
    %155 = arith.mulf %148, %154 : vector<8x64xf32>
    %c6_i32 = arith.constant 6 : i32
    %c8_i32_39 = arith.constant 8 : i32
    %156 = arith.muli %c6_i32, %c8_i32_39 : i32
    %157 = tpu.assume_multiple %156, 8 : i32
    %158 = arith.index_cast %157 : i32 to index
    %c0_40 = arith.constant 0 : index
    %159 = vector.load %arg7[%158, %c0_40] : memref<64x256xf32, #tpu.memory_space<vmem>>, vector<8x256xf32>
    %cst_41 = arith.constant dense<0.000000e+00> : vector<8x256xf32>
    %160 = tpu.matmul %155, %21, %cst_41 {dimension_numbers = #tpu.dot_dimension_numbers<[1], [0], [0], [1], [0, 0, 1, 1], [], []>} : vector<8x64xf32>, vector<64x256xf32>, vector<8x256xf32> -> vector<8x256xf32>
    %161 = arith.addf %159, %160 : vector<8x256xf32>
    %162 = vector.extract_strided_slice %161 {offsets = [0, 0], sizes = [8, 192], strides = [1, 1]} : vector<8x256xf32> to vector<8x192xf32>
    %163 = arith.negf %162 : vector<8x192xf32>
    %164 = math.exp %163 : vector<8x192xf32>
    %cst_42 = arith.constant 1.000000e+00 : f32
    %165 = vector.broadcast %cst_42 : f32 to vector<8x192xf32>
    %166 = arith.addf %165, %164 : vector<8x192xf32>
    %167 = arith.divf %165, %166 : vector<8x192xf32>
    %168 = vector.extract_strided_slice %167 {offsets = [0, 0], sizes = [8, 64], strides = [1, 1]} : vector<8x192xf32> to vector<8x64xf32>
    %169 = vector.extract_strided_slice %167 {offsets = [0, 64], sizes = [8, 64], strides = [1, 1]} : vector<8x192xf32> to vector<8x64xf32>
    %170 = vector.extract_strided_slice %167 {offsets = [0, 128], sizes = [8, 64], strides = [1, 1]} : vector<8x192xf32> to vector<8x64xf32>
    %171 = vector.extract_strided_slice %161 {offsets = [0, 192], sizes = [8, 64], strides = [1, 1]} : vector<8x256xf32> to vector<8x64xf32>
    %172 = math.tanh %171 : vector<8x64xf32>
    %173 = arith.mulf %169, %153 : vector<8x64xf32>
    %174 = arith.mulf %168, %172 : vector<8x64xf32>
    %175 = arith.addf %173, %174 : vector<8x64xf32>
    %176 = math.tanh %175 : vector<8x64xf32>
    %177 = arith.mulf %170, %176 : vector<8x64xf32>
    %c7_i32 = arith.constant 7 : i32
    %c8_i32_43 = arith.constant 8 : i32
    %178 = arith.muli %c7_i32, %c8_i32_43 : i32
    %179 = tpu.assume_multiple %178, 8 : i32
    %180 = arith.index_cast %179 : i32 to index
    %c0_44 = arith.constant 0 : index
    %181 = vector.load %arg7[%180, %c0_44] : memref<64x256xf32, #tpu.memory_space<vmem>>, vector<8x256xf32>
    %cst_45 = arith.constant dense<0.000000e+00> : vector<8x256xf32>
    %182 = tpu.matmul %177, %21, %cst_45 {dimension_numbers = #tpu.dot_dimension_numbers<[1], [0], [0], [1], [0, 0, 1, 1], [], []>} : vector<8x64xf32>, vector<64x256xf32>, vector<8x256xf32> -> vector<8x256xf32>
    %183 = arith.addf %181, %182 : vector<8x256xf32>
    %184 = vector.extract_strided_slice %183 {offsets = [0, 0], sizes = [8, 192], strides = [1, 1]} : vector<8x256xf32> to vector<8x192xf32>
    %185 = arith.negf %184 : vector<8x192xf32>
    %186 = math.exp %185 : vector<8x192xf32>
    %cst_46 = arith.constant 1.000000e+00 : f32
    %187 = vector.broadcast %cst_46 : f32 to vector<8x192xf32>
    %188 = arith.addf %187, %186 : vector<8x192xf32>
    %189 = arith.divf %187, %188 : vector<8x192xf32>
    %190 = vector.extract_strided_slice %189 {offsets = [0, 0], sizes = [8, 64], strides = [1, 1]} : vector<8x192xf32> to vector<8x64xf32>
    %191 = vector.extract_strided_slice %189 {offsets = [0, 64], sizes = [8, 64], strides = [1, 1]} : vector<8x192xf32> to vector<8x64xf32>
    %192 = vector.extract_strided_slice %189 {offsets = [0, 128], sizes = [8, 64], strides = [1, 1]} : vector<8x192xf32> to vector<8x64xf32>
    %193 = vector.extract_strided_slice %183 {offsets = [0, 192], sizes = [8, 64], strides = [1, 1]} : vector<8x256xf32> to vector<8x64xf32>
    %194 = math.tanh %193 : vector<8x64xf32>
    %195 = arith.mulf %191, %175 : vector<8x64xf32>
    %196 = arith.mulf %190, %194 : vector<8x64xf32>
    %197 = arith.addf %195, %196 : vector<8x64xf32>
    %198 = math.tanh %197 : vector<8x64xf32>
    %199 = arith.mulf %192, %198 : vector<8x64xf32>
    %c8_i32_47 = arith.constant 8 : i32
    %c0_48 = arith.constant 0 : index
    %c0_49 = arith.constant 0 : index
    %c0_50 = arith.constant 0 : index
    %200 = vector.load %arg6[%c0_48, %c0_49, %c0_50] : memref<1x8x64xf32, #tpu.memory_space<vmem>>, vector<1x8x64xf32>
    %201 = vector.shape_cast %200 : vector<1x8x64xf32> to vector<8x64xf32>
    %202 = vector.shape_cast %199 : vector<8x64xf32> to vector<1x8x64xf32>
    tpu.vector_store %arg6[%c0_48, %c0_49, %c0_50], %202 {strides = array<i32>} : memref<1x8x64xf32, #tpu.memory_space<vmem>>, vector<1x8x64xf32>,
    return
  }
}

</mosaic_0001>

<bundles_post_ra>
// kernel: tpu_custom_call.1
= control target key start
LH: loop header
LB: loop body
LE: loop exit
PB: predicated region body
PF: predicated region fallthrough
CT: control target
= control target key end

     0   :  { %11 = vsyncpa [#allocation4], 0  ;;  %s1861_s0 = inlined_call_operand.vmem [shape: f32[64,2], index: 0, kind: input, shape index: {}]   ;;  %s1862_s1 = inlined_call_operand.vmem [shape: f32[2,64], index: 1, kind: input, shape index: {}]   ;;  %s1863_s2 = inlined_call_operand.vmem [shape: f32[1,64], index: 2, kind: input, shape index: {}]   ;;  %s1864_s3 = inlined_call_operand.hbm [shape: f32[64,256], index: 3, kind: input, shape index: {}]   ;;  %s1865_s4 = inlined_call_operand.vmem [shape: f32[1,256], index: 4, kind: input, shape index: {}]   ;;  %s1866_s5 = inlined_call_operand.hbm [shape: f32[64,256], index: 5, kind: input, shape index: {}]   ;;  %s1867_s6 = inlined_call_operand.hbm [shape: f32[1,8,64], index: 6, kind: output, shape index: {}]  }
   0x1   :  { %12 = vsyncpa [#allocation7], 0 }
   0x2   :  { %13 = vsyncpa [#allocation5], 0  ;;  %s24_s23 = sshll.u32 %s1864_s3, 4  ;;  %s1454_s24 = smov [#allocation3]   ;;  %s25_s23 = int_to_ptr.hbm [resolvable:$true] %s24_s23 }
   0x3   :  { %s26_s25 = sshll.u32 %s1454_s24, 4  ;;  %s39_s28 = sshll.u32 %s1866_s5, 4  ;;  %s27_s25 = int_to_ptr.vmem [resolvable:$true] %s26_s25  ;;  %s40_s28 = int_to_ptr.hbm [resolvable:$true] %s39_s28 }
   0x4   :  { %s1455_s29 = smov 256   ;;  %s1456_s30 = smov 16  }
   0x5   :  { %32 = dma.hbm_to_vmem [thread:$0]  %s25_s23, 2048, %s27_s25, [#allocation4], %s1455_s29, %s1455_s29, %s1456_s30  }
   0x6   :  { %s1457_s7 = smov [#allocation6]  }
   0x7   :  { %s41_s8 = sshll.u32 %s1457_s7, 4  ;;  %s42_s8 = int_to_ptr.vmem [resolvable:$true] %s41_s8 }
   0x8   :  { %47 = dma.hbm_to_vmem [thread:$0]  %s40_s28, 2048, %s42_s8, [#allocation7], %s1455_s29, %s1455_s29, %s1456_s30  }
   0x9   :  { %1448 = dma.done.wait [#allocation4], 2048  }
   0xa   :  { %1449 = vsyncadd [#allocation4], 4294965248 }
   0xb   :  { %1450 = dma.done.wait [#allocation7], 2048  }
   0xc   :  { %1451 = vsyncadd [#allocation7], 4294965248  ;;  %v1458_v0 = vmov 0   ;;  %v56_v1 = vld [vmem:[%s1861_s0] sm:$0xff]  ;;  %v1510_v2 = vld [vmem:[#allocation6 + $0x70] sm:$0xff]  ;;  %v1459_v6 = vmov 1  }
   0xd   :  { %1266 = vset.pattern.permute.xlu0 %v1458_v0  ;;  %1268 = vset.pattern.permute.xlu2 %v1458_v0  ;;  %v1512_v3 = vld [vmem:[#allocation6 + $0x78] sm:$0xff]  ;;  %v1515_v4 = vld [vmem:[#allocation6 + $0x60] sm:$0xff]  ;;  %v1517_v5 = vld [vmem:[#allocation6 + $0x68] sm:$0xff]  ;;  %v1460_v33 = vmov 0.0   ;;  %vm198_vm0 = vcmask 523264   ;;  %s1461_s15 = smov 64  }
   0xe   :  { %1270 = vset.pattern.permute.xlu1 %v1458_v0  ;;  %67 = vperm.xlu0 %1266, %v56_v1   ;;  %v190_v7 = vld [vmem:[#allocation3 + $0x70] sm:$0xff]  ;;  %v191_v8 = vld [vmem:[#allocation3 + $0x78] sm:$0xff]  ;;  %v188_v11 = vld [vmem:[#allocation3 + $0x60] sm:$0xff]  ;;  %s1193_s8 = sshll.u32 %s1867_s6, 4  ;;  %s1194_s8 = int_to_ptr.hbm [resolvable:$true] %s1193_s8 }
   0xf   :  { %353 = vmatpush.msra.mxu2 %v1510_v2  ;;  %373 = vmatpush.msra.mxu3 %v1512_v3  ;;  %v1524_v9 = vld [vmem:[#allocation6 + $0x50] sm:$0xff]  ;;  %v1526_v10 = vld [vmem:[#allocation6 + $0x58] sm:$0xff]  ;;  %v189_v12 = vld [vmem:[#allocation3 + $0x68] sm:$0xff] }
  0x10   :  { %231 = vmatpush.msra.mxu0 %v190_v7  ;;  %272 = vmatpush.msra.mxu1 %v191_v8  ;;  %v1530_v13 = vld [vmem:[#allocation6 + $0x40] sm:$0xff]  ;;  %v1532_v14 = vld [vmem:[#allocation6 + $0x48] sm:$0xff]  ;;  %v186_v15 = vld [vmem:[#allocation3 + $0x50] sm:$0xff] }
  0x11   :  { %354 = vmatpush.msra.mxu2 %v1515_v4  ;;  %374 = vmatpush.msra.mxu3 %v1517_v5  ;;  %v187_v16 = vld [vmem:[#allocation3 + $0x58] sm:$0xff]  ;;  %v1534_v17 = vld [vmem:[#allocation6 + $0x30] sm:$0xff]  ;;  %v184_v19 = vld [vmem:[#allocation3 + $0x40] sm:$0xff] }
  0x12   :  { %232 = vmatpush.msra.mxu0 %v188_v11  ;;  %273 = vmatpush.msra.mxu1 %v189_v12  ;;  %v1536_v18 = vld [vmem:[#allocation6 + $0x38] sm:$0xff]  ;;  %v185_v20 = vld [vmem:[#allocation3 + $0x48] sm:$0xff]  ;;  %v1540_v21 = vld [vmem:[#allocation6 + $0x20] sm:$0xff] }
  0x13   :  { %355 = vmatpush.msra.mxu2 %v1524_v9  ;;  %375 = vmatpush.msra.mxu3 %v1526_v10  ;;  %v1542_v22 = vld [vmem:[#allocation6 + $0x28] sm:$0xff]  ;;  %v182_v23 = vld [vmem:[#allocation3 + $0x30] sm:$0xff]  ;;  %v183_v24 = vld [vmem:[#allocation3 + $0x38] sm:$0xff] }
  0x14   :  { %233 = vmatpush.msra.mxu0 %v186_v15  ;;  %274 = vmatpush.msra.mxu1 %v187_v16  ;;  %v1546_v25 = vld [vmem:[#allocation6 + $0x10] sm:$0xff]  ;;  %v1548_v26 = vld [vmem:[#allocation6 + $0x18] sm:$0xff]  ;;  %v180_v27 = vld [vmem:[#allocation3 + $0x20] sm:$0xff] }
  0x15   :  { %356 = vmatpush.msra.mxu2 %v1530_v13  ;;  %376 = vmatpush.msra.mxu3 %v1532_v14  ;;  %v181_v28 = vld [vmem:[#allocation3 + $0x28] sm:$0xff]  ;;  %v1554_v29 = vld [vmem:[#allocation6] sm:$0xff]  ;;  %v178_v31 = vld [vmem:[#allocation3 + $0x10] sm:$0xff] }
  0x16   :  { %1267 = vset.pattern.permute.xlu0 %v1459_v6  ;;  %234 = vmatpush.msra.mxu0 %v184_v19  ;;  %v1556_v30 = vld [vmem:[#allocation6 + $0x8] sm:$0xff]  ;;  %v179_v32 = vld [vmem:[#allocation3 + $0x18] sm:$0xff]  ;;  %v176_v34 = vld [vmem:[#allocation3] sm:$0xff] }
  0x17   :  { %116 = vperm.xlu0 %1267, %v56_v1   ;;  %357 = vmatpush.msra.mxu2 %v1534_v17  ;;  %v177_v35 = vld [vmem:[#allocation3 + $0x8] sm:$0xff]  ;;  %v1603_v37 = vld [vmem:[%s1862_s1] ss:$0 sm:$0xff]  ;;  %v1608_v38 = vld [vmem:[%s1862_s1 + $0x1] ss:$0 sm:$0xff] }
  0x18   :  { %377 = vmatpush.msra.mxu3 %v1536_v18  ;;  %275 = vmatpush.msra.mxu1 %v185_v20  ;;  %v1619_v42 = vld [vmem:[%s1863_s2] ss:$0 sm:$0xff]  ;;  %v57_v20 = vld [vmem:[%s1861_s0 + $0x8] sm:$0xff] }
  0x19   :  { %358 = vmatpush.msra.mxu2 %v1540_v21  ;;  %235 = vmatpush.msra.mxu0 %v182_v23  ;;  %v192_v45 = vld [vmem:[%s1865_s4] sm:$0x3] }
  0x1a   :  { %378 = vmatpush.msra.mxu3 %v1542_v22  ;;  %276 = vmatpush.msra.mxu1 %v183_v24  ;;  %v1647_v46 = vperm.slane %v192_v45, 1  ;;  %v1651_v52 = vperm.slane %v192_v45, 0 }
  0x1b   :  { %359 = vmatpush.msra.mxu2 %v1546_v25  ;;  %236 = vmatpush.msra.mxu0 %v180_v27 }
  0x1c   :  { %379 = vmatpush.msra.mxu3 %v1548_v26  ;;  %277 = vmatpush.msra.mxu1 %v181_v28 }
  0x1d   :  { %360 = vmatpush.msra.mxu2 %v1554_v29  ;;  %237 = vmatpush.msra.mxu0 %v178_v31 }
  0x1e   :  { %380 = vmatpush.msra.mxu3 %v1556_v30  ;;  %361 = vmatmul.f32.vlgmr.msra.gmra.mxu2 %v1460_v33 }
  0x1f   :  { %1271 = vset.pattern.permute.xlu0 %v1458_v0  ;;  %381 = vmatmul.f32.vlgmr.msra.gmra.mxu3 %v1460_v33 }
  0x20   :  { %278 = vmatpush.msra.mxu1 %v179_v32  ;;  %459 = vmatpush.msrb.mxu2 %v1510_v2 }
  0x21   :  { %479 = vmatpush.msrb.mxu3 %v1512_v3  ;;  %238 = vmatpush.msra.mxu0 %v176_v34 }
  0x22   :  { %279 = vmatpush.msra.mxu1 %v177_v35  ;;  %460 = vmatpush.msrb.mxu2 %v1515_v4 }
  0x23   :  { %480 = vmatpush.msrb.mxu3 %v1517_v5  ;;  %777 = vmatpush.msrb.mxu0 %v1510_v2 }
  0x24   :  { %797 = vmatpush.msrb.mxu1 %v1512_v3  ;;  %461 = vmatpush.msrb.mxu2 %v1524_v9 }
  0x25   :  { %481 = vmatpush.msrb.mxu3 %v1526_v10  ;;  %778 = vmatpush.msrb.mxu0 %v1515_v4 }
  0x26   :  { %798 = vmatpush.msrb.mxu1 %v1517_v5  ;;  %462 = vmatpush.msrb.mxu2 %v1530_v13 }
  0x27   :  { %482 = vmatpush.msrb.mxu3 %v1532_v14  ;;  %779 = vmatpush.msrb.mxu0 %v1524_v9 }
  0x28   :  { %799 = vmatpush.msrb.mxu1 %v1526_v10  ;;  %463 = vmatpush.msrb.mxu2 %v1534_v17 }
  0x29   :  { %483 = vmatpush.msrb.mxu3 %v1536_v18  ;;  %780 = vmatpush.msrb.mxu0 %v1530_v13 }
  0x2a   :  { %800 = vmatpush.msrb.mxu1 %v1532_v14  ;;  %464 = vmatpush.msrb.mxu2 %v1540_v21 }
  0x2b   :  { %484 = vmatpush.msrb.mxu3 %v1542_v22  ;;  %781 = vmatpush.msrb.mxu0 %v1534_v17 }
  0x2c   :  { %801 = vmatpush.msrb.mxu1 %v1536_v18  ;;  %465 = vmatpush.msrb.mxu2 %v1546_v25 }
  0x2d   :  { %485 = vmatpush.msrb.mxu3 %v1548_v26  ;;  %782 = vmatpush.msrb.mxu0 %v1540_v21 }
  0x2e   :  { %802 = vmatpush.msrb.mxu1 %v1542_v22  ;;  %466 = vmatpush.msrb.mxu2 %v1554_v29 }
  0x2f   :  { %486 = vmatpush.msrb.mxu3 %v1556_v30  ;;  %783 = vmatpush.msrb.mxu0 %v1546_v25 }
  0x30   :  { %565 = vmatpush.msra.mxu2 %v1510_v2  ;;  %803 = vmatpush.msrb.mxu1 %v1548_v26 }
  0x31   :  { %585 = vmatpush.msra.mxu3 %v1512_v3  ;;  %784 = vmatpush.msrb.mxu0 %v1554_v29 }
  0x32   :  { %566 = vmatpush.msra.mxu2 %v1515_v4  ;;  %804 = vmatpush.msrb.mxu1 %v1556_v30 }
  0x33   :  { %586 = vmatpush.msra.mxu3 %v1517_v5  ;;  %72 = vperm.xlu2 %1268, %v57_v20  }
  0x34   :  { %567 = vmatpush.msra.mxu2 %v1524_v9 }
  0x35   :  { %587 = vmatpush.msra.mxu3 %v1526_v10 }
  0x36   :  { %568 = vmatpush.msra.mxu2 %v1530_v13 }
  0x37   :  { %588 = vmatpush.msra.mxu3 %v1532_v14 }
  0x38   :  { %569 = vmatpush.msra.mxu2 %v1534_v17 }
  0x39   :  { %589 = vmatpush.msra.mxu3 %v1536_v18 }
  0x3a   :  { %570 = vmatpush.msra.mxu2 %v1540_v21 }
  0x3b   :  { %590 = vmatpush.msra.mxu3 %v1542_v22  ;;  %1269 = vset.pattern.permute.xlu2 %v1459_v6 }
  0x3c   :  { %571 = vmatpush.msra.mxu2 %v1546_v25  ;;  %120 = vperm.xlu2 %1269, %v57_v20  }
  0x3d   :  { %591 = vmatpush.msra.mxu3 %v1548_v26 }
  0x3e   :  { %572 = vmatpush.msra.mxu2 %v1554_v29 }
  0x3f   :  { %592 = vmatpush.msra.mxu3 %v1556_v30 }
  0x80   :  { %v68_v36 = vpop.permute.xlu0 %67 }
  0x81   :  { %v106_v40 = vmul.f32 %v1603_v37, %v68_v36 }
  0x89   :  { %v117_v39 = vpop.permute.xlu0 %116 }
  0x8a   :  { %v148_v41 = vmul.f32 %v1608_v38, %v117_v39 }
  0x8c   :  { %v156_v43 = vadd.f32 %v148_v41, %v106_v40 }
  0x8d   :  { %v73_v31 = vpop.permute.xlu2 %72 }
  0x8e   :  { %v168_v44 = vadd.f32 %v1619_v42, %v156_v43  ;;  %v107_v32 = vmul.f32 %v1603_v37, %v73_v31 }
  0x90   :  { %1211 = vmatmul.msk.f32.vlgmr.msra.gmra.mxu0 %vm198_vm0, %v168_v44  ;;  %1219 = vmatmul.msk.f32.vlgmr.msra.gmra.mxu1 %vm198_vm0, %v168_v44 }
  0x91   :  { %989 = vmatpush.msra.mxu0 %v1510_v2  ;;  %1009 = vmatpush.msra.mxu1 %v1512_v3 }
  0x93   :  { %990 = vmatpush.msra.mxu0 %v1515_v4  ;;  %1010 = vmatpush.msra.mxu1 %v1517_v5 }
  0x95   :  { %991 = vmatpush.msra.mxu0 %v1524_v9  ;;  %1011 = vmatpush.msra.mxu1 %v1526_v10 }
  0x96   :  { %v121_v33 = vpop.permute.xlu2 %120 }
  0x97   :  { %992 = vmatpush.msra.mxu0 %v1530_v13  ;;  %1012 = vmatpush.msra.mxu1 %v1532_v14  ;;  %v149_v35 = vmul.f32 %v1608_v38, %v121_v33 }
  0x99   :  { %993 = vmatpush.msra.mxu0 %v1534_v17  ;;  %1013 = vmatpush.msra.mxu1 %v1536_v18  ;;  %v157_v36 = vadd.f32 %v149_v35, %v107_v32 }
  0x9b   :  { %994 = vmatpush.msra.mxu0 %v1540_v21  ;;  %1014 = vmatpush.msra.mxu1 %v1542_v22  ;;  %v169_v39 = vadd.f32 %v1619_v42, %v157_v36 }
  0x9d   :  { %995 = vmatpush.msra.mxu0 %v1546_v25  ;;  %1015 = vmatpush.msra.mxu1 %v1548_v26 }
  0x9e   :  { %1212 = vmatmul.msk.f32.gmra.mxu0 %vm198_vm0, %v169_v39  ;;  %1220 = vmatmul.msk.f32.gmra.mxu1 %vm198_vm0, %v169_v39 }
  0x9f   :  { %996 = vmatpush.msra.mxu0 %v1554_v29  ;;  %1016 = vmatpush.msra.mxu1 %v1556_v30 }
  0xa1   :  { %v362_v55 = vpop.f32.mrf.mxu2 }
  0xa2   :  { %v382_v48 = vpop.f32.mrf.mxu3 }
 0x10d   :  { %v281_v47 = vpop.f32.mrf.mxu1  ;;  %v240_v53 = vpop.f32.mrf.mxu0 }
 0x10e   :  { %v282_v49 = vadd.f32 %v281_v47, %v1647_v46  ;;  %v241_v54 = vadd.f32 %v240_v53, %v1651_v52 }
 0x110   :  { %v386_v50 = vadd.f32 %v382_v48, %v282_v49  ;;  %v385_v56 = vadd.f32 %v362_v55, %v241_v54 }
 0x112   :  { %1280 = vtanh.f32 %v386_v50  ;;  %v1227_v57 = vmul.f32 -1.442695, %v385_v56  ;;  %v1228_v34 = vmul.f32 -1.442695, %v386_v50 }
 0x114   :  { %1282 = vpow2.f32 %v1227_v57  ;;  %v58_v57 = vld [vmem:[%s1861_s0 + $0x10] sm:$0xff] }
 0x118   :  { %v1281_v51 = vpop.eup %1280 }
 0x119   :  { %428 = vrot.lane.b32.xlu1 %v1281_v51, %s1461_s15 }
 0x11a   :  { %v1283_v58 = vpop.eup %1282 }
 0x11b   :  { %v393_v59 = vadd.f32 1.0, %v1283_v58  ;;  %v284_v58 = vpop.f32.mrf.mxu1 }
 0x11d   :  { %1284 = vrcp.f32 %v393_v59  ;;  %v406_v7 = vand.u32 2147483648, %v393_v59  ;;  %vm400_vm2 = vweird.f32 %v393_v59  ;;  %v404_v8 = vand.u32 2147483647, %v393_v59 }
 0x11f   :  { %v407_v12 = vor.u32 1.1754944e-38, %v406_v7  ;;  %vm405_vm4 = vcmp.eq.f32.partialorder %v404_v8, 8.507059e+37 }
 0x123   :  { %v1285_v60 = vpop.eup %1284 }
 0x124   :  { %v396_v61 = vmul.f32 %v1285_v60, %v393_v59  ;;  %vm401_vm1 = vweird.f32 %v1285_v60  ;;  %v285_v59 = vadd.f32 %v284_v58, %v1647_v46 }
 0x125   :  { %vm402_vm3 = vmor %vm400_vm2, %vm401_vm1 }
 0x126   :  { %v397_v62 = vsub.f32 1.0, %v396_v61 }
 0x128   :  { %v398_v63 = vmul.f32 %v1285_v60, %v397_v62 }
 0x12a   :  { %v399_v1 = vadd.f32 %v1285_v60, %v398_v63  ;;  %v243_v63 = vpop.f32.mrf.mxu0 }
 0x12b   :  { %v244_v7 = vadd.f32 %v243_v63, %v1651_v52 }
 0x12c   :  { %v403_v11 = vsel %vm402_vm3, %v1285_v60, %v399_v1 }
 0x12d   :  { %v408_v16 = vsel %vm405_vm4, %v407_v12, %v403_v11 }
 0x12e   :  { %v426_v23 = vmul.f32 0.0, %v408_v16 }
 0x18b   :  { %v429_v15 = vpop.permute.xlu1 %428 }
 0x18c   :  { %v431_v19 = vmul.f32 %v429_v15, %v408_v16 }
 0x18e   :  { %433 = vrot.lane.b32.xlu1 %v431_v19, %s1461_s15 }
 0x200   :  { %v434_v24 = vpop.permute.xlu1 %433 }
 0x201   :  { %v1659_v27 = vadd.f32 %v434_v24, %v426_v23 }
 0x203   :  { %1286 = vtanh.f32 %v1659_v27 }
 0x204   :  { %1288 = vpow2.f32 %v1228_v34 }
 0x209   :  { %v1287_v28 = vpop.eup %1286 }
 0x20a   :  { %439 = vrot.lane.b32.xlu1 %v1287_v28, %s1461_s15  ;;  %v1289_v40 = vpop.eup %1288 }
 0x20b   :  { %v394_v41 = vadd.f32 1.0, %v1289_v40 }
 0x20d   :  { %1290 = vrcp.f32 %v394_v41  ;;  %v421_v49 = vand.u32 2147483648, %v394_v41  ;;  %vm415_vm6 = vweird.f32 %v394_v41  ;;  %v419_v50 = vand.u32 2147483647, %v394_v41 }
 0x20f   :  { %v422_v53 = vor.u32 1.1754944e-38, %v421_v49  ;;  %vm420_vm8 = vcmp.eq.f32.partialorder %v419_v50, 8.507059e+37 }
 0x212   :  { %77 = vperm.xlu1 %1270, %v58_v57  }
 0x213   :  { %v1291_v43 = vpop.eup %1290 }
 0x214   :  { %v411_v44 = vmul.f32 %v1291_v43, %v394_v41  ;;  %vm416_vm5 = vweird.f32 %v1291_v43 }
 0x215   :  { %vm417_vm7 = vmor %vm415_vm6, %vm416_vm5 }
 0x216   :  { %v412_v45 = vsub.f32 1.0, %v411_v44 }
 0x218   :  { %v413_v47 = vmul.f32 %v1291_v43, %v412_v45 }
 0x21a   :  { %v414_v48 = vadd.f32 %v1291_v43, %v413_v47  ;;  %1272 = vset.pattern.permute.xlu1 %v1459_v6 }
 0x21c   :  { %v418_v51 = vsel %vm417_vm7, %v1291_v43, %v414_v48 }
 0x21d   :  { %v423_v54 = vsel %vm420_vm8, %v422_v53, %v418_v51 }
 0x27c   :  { %v440_v55 = vpop.permute.xlu1 %439 }
 0x27d   :  { %v442_v56 = vmul.f32 %v440_v55, %v423_v54 }
 0x27f   :  { %1229 = vmatmul.msk.f32.vlgmr.msrb.gmra.mxu2 %vm198_vm0, %v442_v56  ;;  %1230 = vmatmul.msk.f32.vlgmr.msrb.gmra.mxu3 %vm198_vm0, %v442_v56 }
 0x280   :  { %671 = vmatpush.msrb.mxu2 %v1510_v2  ;;  %691 = vmatpush.msrb.mxu3 %v1512_v3 }
 0x282   :  { %672 = vmatpush.msrb.mxu2 %v1515_v4  ;;  %692 = vmatpush.msrb.mxu3 %v1517_v5 }
 0x284   :  { %673 = vmatpush.msrb.mxu2 %v1524_v9  ;;  %693 = vmatpush.msrb.mxu3 %v1526_v10  ;;  %v78_v39 = vpop.permute.xlu1 %77 }
 0x285   :  { %v108_v40 = vmul.f32 %v1603_v37, %v78_v39 }
 0x286   :  { %674 = vmatpush.msrb.mxu2 %v1530_v13  ;;  %694 = vmatpush.msrb.mxu3 %v1532_v14 }
 0x288   :  { %675 = vmatpush.msrb.mxu2 %v1534_v17  ;;  %695 = vmatpush.msrb.mxu3 %v1536_v18 }
 0x28a   :  { %676 = vmatpush.msrb.mxu2 %v1540_v21  ;;  %696 = vmatpush.msrb.mxu3 %v1542_v22 }
 0x28c   :  { %677 = vmatpush.msrb.mxu2 %v1546_v25  ;;  %697 = vmatpush.msrb.mxu3 %v1548_v26 }
 0x28e   :  { %678 = vmatpush.msrb.mxu2 %v1554_v29  ;;  %698 = vmatpush.msrb.mxu3 %v1556_v30 }
 0x302   :  { %v488_v60 = vpop.f32.mrf.mxu3  ;;  %v468_v1 = vpop.f32.mrf.mxu2 }
 0x303   :  { %v492_v61 = vadd.f32 %v488_v60, %v285_v59  ;;  %v491_v8 = vadd.f32 %v468_v1, %v244_v7 }
 0x305   :  { %1292 = vtanh.f32 %v492_v61  ;;  %v1231_v11 = vmul.f32 -1.442695, %v491_v8  ;;  %v1232_v51 = vmul.f32 -1.442695, %v492_v61 }
 0x307   :  { %1294 = vpow2.f32 %v1231_v11 }
 0x30b   :  { %v1293_v62 = vpop.eup %1292 }
 0x30c   :  { %534 = vrot.lane.b32.xlu2 %v1293_v62, %s1461_s15 }
 0x30d   :  { %v1295_v12 = vpop.eup %1294 }
 0x30e   :  { %v499_v15 = vadd.f32 1.0, %v1295_v12 }
 0x310   :  { %1296 = vrcp.f32 %v499_v15  ;;  %v512_v28 = vand.u32 2147483648, %v499_v15  ;;  %vm506_vm10 = vweird.f32 %v499_v15  ;;  %v510_v31 = vand.u32 2147483647, %v499_v15 }
 0x312   :  { %v513_v33 = vor.u32 1.1754944e-38, %v512_v28  ;;  %vm511_vm12 = vcmp.eq.f32.partialorder %v510_v31, 8.507059e+37 }
 0x314   :  { %124 = vperm.xlu2 %1269, %v58_v57  }
 0x316   :  { %v1297_v16 = vpop.eup %1296 }
 0x317   :  { %v502_v19 = vmul.f32 %v1297_v16, %v499_v15  ;;  %vm507_vm9 = vweird.f32 %v1297_v16 }
 0x318   :  { %vm508_vm11 = vmor %vm506_vm10, %vm507_vm9 }
 0x319   :  { %v503_v20 = vsub.f32 1.0, %v502_v19 }
 0x31b   :  { %v504_v23 = vmul.f32 %v1297_v16, %v503_v20 }
 0x31c   :  { %1273 = vset.pattern.permute.xlu2 %v1458_v0 }
 0x31d   :  { %v505_v24 = vadd.f32 %v1297_v16, %v504_v23 }
 0x31f   :  { %v509_v32 = vsel %vm508_vm11, %v1297_v16, %v505_v24 }
 0x320   :  { %v514_v35 = vsel %vm511_vm12, %v513_v33, %v509_v32  ;;  %v59_v33 = vld [vmem:[%s1861_s0 + $0x18] sm:$0xff] }
 0x321   :  { %v532_v47 = vmul.f32 %v514_v35, %v1659_v27 }
 0x366   :  { %v535_v34 = vpop.permute.xlu2 %534 }
 0x367   :  { %v537_v36 = vmul.f32 %v535_v34, %v514_v35  ;;  %v1732_v34 = vld [vmem:[%s1861_s0 + $0x20] sm:$0xff] }
 0x369   :  { %539 = vrot.lane.b32.xlu0 %v537_v36, %s1461_s15 }
 0x36e   :  { %v125_v41 = vpop.permute.xlu2 %124 }
 0x36f   :  { %v150_v43 = vmul.f32 %v1608_v38, %v125_v41 }
 0x371   :  { %v158_v44 = vadd.f32 %v150_v43, %v108_v40 }
 0x373   :  { %v170_v45 = vadd.f32 %v1619_v42, %v158_v44 }
 0x375   :  { %1213 = vmatmul.msk.f32.gmra.mxu0 %vm198_vm0, %v170_v45  ;;  %1221 = vmatmul.msk.f32.gmra.mxu1 %vm198_vm0, %v170_v45 }
 0x3db   :  { %v540_v48 = vpop.permute.xlu0 %539 }
 0x3dc   :  { %v1701_v49 = vadd.f32 %v540_v48, %v532_v47 }
 0x3de   :  { %1298 = vtanh.f32 %v1701_v49 }
 0x3df   :  { %1300 = vpow2.f32 %v1232_v51 }
 0x3e4   :  { %v1299_v50 = vpop.eup %1298 }
 0x3e5   :  { %545 = vrot.lane.b32.xlu0 %v1299_v50, %s1461_s15  ;;  %v1301_v53 = vpop.eup %1300 }
 0x3e6   :  { %v500_v54 = vadd.f32 1.0, %v1301_v53 }
 0x3e8   :  { %1302 = vrcp.f32 %v500_v54  ;;  %v527_v27 = vand.u32 2147483648, %v500_v54  ;;  %vm521_vm14 = vweird.f32 %v500_v54  ;;  %v525_v60 = vand.u32 2147483647, %v500_v54 }
 0x3ea   :  { %v528_v63 = vor.u32 1.1754944e-38, %v527_v27  ;;  %vm526_vm1 = vcmp.eq.f32.partialorder %v525_v60, 8.507059e+37 }
 0x3ed   :  { %82 = vperm.xlu0 %1271, %v59_v33  }
 0x3ee   :  { %v1303_v55 = vpop.eup %1302 }
 0x3ef   :  { %v517_v56 = vmul.f32 %v1303_v55, %v500_v54  ;;  %vm522_vm13 = vweird.f32 %v1303_v55 }
 0x3f0   :  { %vm523_vm15 = vmor %vm521_vm14, %vm522_vm13 }
 0x3f1   :  { %v518_v57 = vsub.f32 1.0, %v517_v56 }
 0x3f2   :  { %v287_v8 = vpop.f32.mrf.mxu1  ;;  %v246_v19 = vpop.f32.mrf.mxu0 }
 0x3f3   :  { %v519_v58 = vmul.f32 %v1303_v55, %v518_v57  ;;  %v288_v11 = vadd.f32 %v287_v8, %v1647_v46  ;;  %v247_v23 = vadd.f32 %v246_v19, %v1651_v52 }
 0x3f5   :  { %v520_v59 = vadd.f32 %v1303_v55, %v519_v58  ;;  %87 = vperm.xlu0 %1271, %v1732_v34  }
 0x3f7   :  { %v524_v62 = vsel %vm523_vm15, %v1303_v55, %v520_v59 }
 0x3f8   :  { %v529_v1 = vsel %vm526_vm1, %v528_v63, %v524_v62 }
 0x3fd   :  { %1274 = vset.pattern.permute.xlu0 %v1459_v6 }
 0x457   :  { %v546_v7 = vpop.permute.xlu0 %545 }
 0x458   :  { %v548_v61 = vmul.f32 %v546_v7, %v529_v1 }
 0x45a   :  { %1233 = vmatmul.msk.f32.vlgmr.msra.gmra.mxu2 %vm198_vm0, %v548_v61  ;;  %1234 = vmatmul.msk.f32.vlgmr.msra.gmra.mxu3 %vm198_vm0, %v548_v61 }
 0x45b   :  { %883 = vmatpush.msra.mxu2 %v1510_v2  ;;  %903 = vmatpush.msra.mxu3 %v1512_v3 }
 0x45d   :  { %884 = vmatpush.msra.mxu2 %v1515_v4  ;;  %904 = vmatpush.msra.mxu3 %v1517_v5 }
 0x45f   :  { %885 = vmatpush.msra.mxu2 %v1524_v9  ;;  %905 = vmatpush.msra.mxu3 %v1526_v10  ;;  %v83_v59 = vpop.permute.xlu0 %82 }
 0x460   :  { %v109_v27 = vmul.f32 %v1603_v37, %v83_v59 }
 0x461   :  { %886 = vmatpush.msra.mxu2 %v1530_v13  ;;  %906 = vmatpush.msra.mxu3 %v1532_v14 }
 0x463   :  { %887 = vmatpush.msra.mxu2 %v1534_v17  ;;  %907 = vmatpush.msra.mxu3 %v1536_v18 }
 0x465   :  { %888 = vmatpush.msra.mxu2 %v1540_v21  ;;  %908 = vmatpush.msra.mxu3 %v1542_v22 }
 0x467   :  { %889 = vmatpush.msra.mxu2 %v1546_v25  ;;  %909 = vmatpush.msra.mxu3 %v1548_v26 }
 0x469   :  { %890 = vmatpush.msra.mxu2 %v1554_v29  ;;  %910 = vmatpush.msra.mxu3 %v1556_v30 }
 0x4dd   :  { %v594_v12 = vpop.f32.mrf.mxu3  ;;  %v574_v20 = vpop.f32.mrf.mxu2 }
 0x4de   :  { %v598_v15 = vadd.f32 %v594_v12, %v288_v11  ;;  %v597_v24 = vadd.f32 %v574_v20, %v247_v23 }
 0x4e0   :  { %1304 = vtanh.f32 %v598_v15  ;;  %v1235_v28 = vmul.f32 -1.442695, %v597_v24  ;;  %v1236_v57 = vmul.f32 -1.442695, %v598_v15 }
 0x4e2   :  { %1306 = vpow2.f32 %v1235_v28 }
 0x4e6   :  { %v1305_v16 = vpop.eup %1304 }
 0x4e7   :  { %640 = vrot.lane.b32.xlu1 %v1305_v16, %s1461_s15 }
 0x4e8   :  { %v1307_v31 = vpop.eup %1306 }
 0x4e9   :  { %v605_v32 = vadd.f32 1.0, %v1307_v31 }
 0x4eb   :  { %1308 = vrcp.f32 %v605_v32  ;;  %v618_v43 = vand.u32 2147483648, %v605_v32  ;;  %vm612_vm3 = vweird.f32 %v605_v32  ;;  %v616_v44 = vand.u32 2147483647, %v605_v32 }
 0x4ed   :  { %v619_v47 = vor.u32 1.1754944e-38, %v618_v43  ;;  %vm617_vm5 = vcmp.eq.f32.partialorder %v616_v44, 8.507059e+37  ;;  %v88_v44 = vpop.permute.xlu0 %87 }
 0x4ef   :  { %128 = vperm.xlu1 %1272, %v59_v33  }
 0x4f1   :  { %v1309_v35 = vpop.eup %1308 }
 0x4f2   :  { %v608_v36 = vmul.f32 %v1309_v35, %v605_v32  ;;  %vm613_vm2 = vweird.f32 %v1309_v35  ;;  %v63_v32 = vld [vmem:[%s1861_s0 + $0x38] sm:$0xff] }
 0x4f3   :  { %vm614_vm4 = vmor %vm612_vm3, %vm613_vm2 }
 0x4f4   :  { %v609_v39 = vsub.f32 1.0, %v608_v36 }
 0x4f6   :  { %v610_v40 = vmul.f32 %v1309_v35, %v609_v39 }
 0x4f8   :  { %v611_v41 = vadd.f32 %v1309_v35, %v610_v40 }
 0x4fa   :  { %v615_v45 = vsel %vm614_vm4, %v1309_v35, %v611_v41 }
 0x4fb   :  { %v620_v50 = vsel %vm617_vm5, %v619_v47, %v615_v45  ;;  %v110_v47 = vmul.f32 %v1603_v37, %v88_v44 }
 0x4fc   :  { %v638_v53 = vmul.f32 %v620_v50, %v1701_v49 }
 0x559   :  { %v641_v48 = vpop.permute.xlu1 %640 }
 0x55a   :  { %v643_v51 = vmul.f32 %v641_v48, %v620_v50 }
 0x55c   :  { %645 = vrot.lane.b32.xlu2 %v643_v51, %s1461_s15 }
 0x561   :  { %v129_v58 = vpop.permute.xlu1 %128 }
 0x562   :  { %v151_v60 = vmul.f32 %v1608_v38, %v129_v58 }
 0x564   :  { %v159_v63 = vadd.f32 %v151_v60, %v109_v27 }
 0x566   :  { %v171_v49 = vadd.f32 %v1619_v42, %v159_v63 }
 0x568   :  { %1214 = vmatmul.msk.f32.gmra.mxu0 %vm198_vm0, %v171_v49  ;;  %1222 = vmatmul.msk.f32.gmra.mxu1 %vm198_vm0, %v171_v49 }
 0x5b6   :  { %v646_v54 = vpop.permute.xlu2 %645 }
 0x5b7   :  { %v1738_v55 = vadd.f32 %v646_v54, %v638_v53 }
 0x5b9   :  { %1310 = vtanh.f32 %v1738_v55 }
 0x5ba   :  { %1312 = vpow2.f32 %v1236_v57 }
 0x5bf   :  { %v1311_v56 = vpop.eup %1310 }
 0x5c0   :  { %651 = vrot.lane.b32.xlu2 %v1311_v56, %s1461_s15  ;;  %v1313_v62 = vpop.eup %1312 }
 0x5c1   :  { %v606_v1 = vadd.f32 1.0, %v1313_v62 }
 0x5c3   :  { %1314 = vrcp.f32 %v606_v1  ;;  %v633_v15 = vand.u32 2147483648, %v606_v1  ;;  %vm627_vm7 = vweird.f32 %v606_v1  ;;  %v631_v16 = vand.u32 2147483647, %v606_v1 }
 0x5c5   :  { %v634_v20 = vor.u32 1.1754944e-38, %v633_v15  ;;  %vm632_vm9 = vcmp.eq.f32.partialorder %v631_v16, 8.507059e+37 }
 0x5c9   :  { %v1315_v7 = vpop.eup %1314 }
 0x5ca   :  { %v623_v61 = vmul.f32 %v1315_v7, %v606_v1  ;;  %vm628_vm6 = vweird.f32 %v1315_v7 }
 0x5cb   :  { %vm629_vm8 = vmor %vm627_vm7, %vm628_vm6 }
 0x5cc   :  { %v624_v8 = vsub.f32 1.0, %v623_v61 }
 0x5ce   :  { %v625_v11 = vmul.f32 %v1315_v7, %v624_v8 }
 0x5d0   :  { %v626_v12 = vadd.f32 %v1315_v7, %v625_v11 }
 0x5d2   :  { %v630_v19 = vsel %vm629_vm8, %v1315_v7, %v626_v12 }
 0x5d3   :  { %v635_v23 = vsel %vm632_vm9, %v634_v20, %v630_v19 }
 0x61a   :  { %v652_v24 = vpop.permute.xlu2 %651 }
 0x61b   :  { %v654_v28 = vmul.f32 %v652_v24, %v635_v23 }
 0x61d   :  { %1237 = vmatmul.msk.f32.vlgmr.msrb.gmra.mxu2 %vm198_vm0, %v654_v28  ;;  %1238 = vmatmul.msk.f32.vlgmr.msrb.gmra.mxu3 %vm198_vm0, %v654_v28 }
 0x61e   :  { %1095 = vmatpush.msrb.mxu2 %v1510_v2  ;;  %1115 = vmatpush.msrb.mxu3 %v1512_v3  ;;  %v290_v2 = vpop.f32.mrf.mxu1 }
 0x61f   :  { %v291_v3 = vadd.f32 %v290_v2, %v1647_v46 }
 0x620   :  { %1096 = vmatpush.msrb.mxu2 %v1515_v4  ;;  %1116 = vmatpush.msrb.mxu3 %v1517_v5 }
 0x622   :  { %1097 = vmatpush.msrb.mxu2 %v1524_v9  ;;  %1117 = vmatpush.msrb.mxu3 %v1526_v10  ;;  %v249_v10 = vpop.f32.mrf.mxu0 }
 0x624   :  { %1098 = vmatpush.msrb.mxu2 %v1530_v13  ;;  %1118 = vmatpush.msrb.mxu3 %v1532_v14  ;;  %v250_v13 = vadd.f32 %v249_v10, %v1651_v52 }
 0x626   :  { %1099 = vmatpush.msrb.mxu2 %v1534_v17  ;;  %1119 = vmatpush.msrb.mxu3 %v1536_v18 }
 0x628   :  { %1100 = vmatpush.msrb.mxu2 %v1540_v21  ;;  %1120 = vmatpush.msrb.mxu3 %v1542_v22 }
 0x62a   :  { %1101 = vmatpush.msrb.mxu2 %v1546_v25  ;;  %1121 = vmatpush.msrb.mxu3 %v1548_v26 }
 0x62c   :  { %1102 = vmatpush.msrb.mxu2 %v1554_v29  ;;  %1122 = vmatpush.msrb.mxu3 %v1556_v30  ;;  %v61_v29 = vld [vmem:[%s1861_s0 + $0x28] sm:$0xff] }
 0x62d   :  { %136 = vperm.xlu0 %1274, %v61_v29  }
 0x69f   :  { %v137_v58 = vpop.permute.xlu0 %136 }
 0x6a0   :  { %v700_v4 = vpop.f32.mrf.mxu3  ;;  %v680_v14 = vpop.f32.mrf.mxu2  ;;  %v153_v27 = vmul.f32 %v1608_v38, %v137_v58 }
 0x6a1   :  { %v1766_v5 = vadd.f32 %v700_v4, %v291_v3  ;;  %v703_v17 = vadd.f32 %v680_v14, %v250_v13 }
 0x6a3   :  { %1316 = vtanh.f32 %v1766_v5  ;;  %v1239_v18 = vmul.f32 -1.442695, %v703_v17  ;;  %v1240_v20 = vmul.f32 -1.442695, %v1766_v5 }
 0x6a5   :  { %1318 = vpow2.f32 %v1239_v18 }
 0x6a9   :  { %v1317_v9 = vpop.eup %1316 }
 0x6aa   :  { %746 = vrot.lane.b32.xlu1 %v1317_v9, %s1461_s15 }
 0x6ab   :  { %v1319_v21 = vpop.eup %1318 }
 0x6ac   :  { %v711_v22 = vadd.f32 1.0, %v1319_v21 }
 0x6ae   :  { %1320 = vrcp.f32 %v711_v22  ;;  %vm718_vm11 = vweird.f32 %v711_v22  ;;  %v722_v35 = vand.u32 2147483647, %v711_v22 }
 0x6b0   :  { %vm723_vm13 = vcmp.eq.f32.partialorder %v722_v35, 8.507059e+37 }
 0x6b2   :  { %132 = vperm.xlu1 %1272, %v1732_v34   ;;  %v724_v34 = vand.u32 2147483648, %v711_v22 }
 0x6b4   :  { %v1321_v25 = vpop.eup %1320  ;;  %v725_v39 = vor.u32 1.1754944e-38, %v724_v34 }
 0x6b5   :  { %v714_v26 = vmul.f32 %v1321_v25, %v711_v22  ;;  %vm719_vm10 = vweird.f32 %v1321_v25 }
 0x6b6   :  { %vm720_vm12 = vmor %vm718_vm11, %vm719_vm10 }
 0x6b7   :  { %v715_v30 = vsub.f32 1.0, %v714_v26 }
 0x6b9   :  { %v716_v31 = vmul.f32 %v1321_v25, %v715_v30 }
 0x6ba   :  { %1275 = vset.pattern.permute.xlu1 %v1458_v0  ;;  %v62_v0 = vld [vmem:[%s1861_s0 + $0x30] sm:$0xff]  ;;  %s1462_s0 = smov [#allocation8]  }
 0x6bb   :  { %97 = vperm.xlu1 %1275, %v62_v0   ;;  %v717_v33 = vadd.f32 %v1321_v25, %v716_v31  ;;  %s1191_s29 = sshll.u32 %s1462_s0, 4  ;;  %s1192_s29 = int_to_ptr.vmem [resolvable:$true] %s1191_s29 }
 0x6bd   :  { %v721_v36 = vsel %vm720_vm12, %v1321_v25, %v717_v33 }
 0x6be   :  { %v726_v41 = vsel %vm723_vm13, %v725_v39, %v721_v36 }
 0x6bf   :  { %v744_v53 = vmul.f32 %v726_v41, %v1738_v55 }
 0x6c3   :  { %102 = vperm.xlu1 %1275, %v63_v32  }
 0x71c   :  { %v747_v40 = vpop.permute.xlu1 %746 }
 0x71d   :  { %v749_v43 = vmul.f32 %v747_v40, %v726_v41 }
 0x71f   :  { %751 = vrot.lane.b32.xlu2 %v749_v43, %s1461_s15 }
 0x724   :  { %v133_v45 = vpop.permute.xlu1 %132 }
 0x725   :  { %v152_v48 = vmul.f32 %v1608_v38, %v133_v45 }
 0x727   :  { %v160_v50 = vadd.f32 %v152_v48, %v110_v47  ;;  %92 = vperm.xlu2 %1273, %v61_v29  }
 0x729   :  { %v172_v51 = vadd.f32 %v1619_v42, %v160_v50 }
 0x72b   :  { %1215 = vmatmul.msk.f32.gmra.mxu0 %vm198_vm0, %v172_v51  ;;  %1223 = vmatmul.msk.f32.gmra.mxu1 %vm198_vm0, %v172_v51 }
 0x72d   :  { %v98_v62 = vpop.permute.xlu1 %97 }
 0x72e   :  { %v112_v55 = vmul.f32 %v1603_v37, %v98_v62 }
 0x72f   :  { %1276 = vset.pattern.permute.xlu2 %v1459_v6 }
 0x730   :  { %140 = vperm.xlu2 %1276, %v62_v0  }
 0x735   :  { %v103_v61 = vpop.permute.xlu1 %102 }
 0x736   :  { %v113_v11 = vmul.f32 %v1603_v37, %v103_v61 }
 0x738   :  { %144 = vperm.xlu2 %1276, %v63_v32  }
 0x779   :  { %v752_v54 = vpop.permute.xlu2 %751 }
 0x77a   :  { %v1790_v56 = vadd.f32 %v752_v54, %v744_v53 }
 0x77c   :  { %1322 = vtanh.f32 %v1790_v56 }
 0x77d   :  { %1324 = vpow2.f32 %v1240_v20 }
 0x781   :  { %v93_v59 = vpop.permute.xlu2 %92 }
 0x782   :  { %v1323_v57 = vpop.eup %1322  ;;  %v111_v60 = vmul.f32 %v1603_v37, %v93_v59 }
 0x783   :  { %757 = vrot.lane.b32.xlu0 %v1323_v57, %s1461_s15  ;;  %v1325_v23 = vpop.eup %1324 }
 0x784   :  { %v161_v6 = vadd.f32 %v153_v27, %v111_v60  ;;  %v712_v24 = vadd.f32 1.0, %v1325_v23 }
 0x786   :  { %v173_v63 = vadd.f32 %v1619_v42, %v161_v6  ;;  %1326 = vrcp.f32 %v712_v24  ;;  %vm733_vm15 = vweird.f32 %v712_v24  ;;  %v737_v9 = vand.u32 2147483647, %v712_v24 }
 0x788   :  { %1216 = vmatmul.msk.f32.gmra.mxu0 %vm198_vm0, %v173_v63  ;;  %1224 = vmatmul.msk.f32.gmra.mxu1 %vm198_vm0, %v173_v63  ;;  %vm738_vm2 = vcmp.eq.f32.partialorder %v737_v9, 8.507059e+37 }
 0x78a   :  { %v141_v1 = vpop.permute.xlu2 %140 }
 0x78b   :  { %v154_v49 = vmul.f32 %v1608_v38, %v141_v1 }
 0x78c   :  { %v1327_v28 = vpop.eup %1326 }
 0x78d   :  { %v162_v7 = vadd.f32 %v154_v49, %v112_v55  ;;  %v729_v2 = vmul.f32 %v1327_v28, %v712_v24  ;;  %vm734_vm14 = vweird.f32 %v1327_v28 }
 0x78e   :  { %vm735_vm1 = vmor %vm733_vm15, %vm734_vm14 }
 0x78f   :  { %v174_v8 = vadd.f32 %v1619_v42, %v162_v7  ;;  %v730_v3 = vsub.f32 1.0, %v729_v2 }
 0x791   :  { %1217 = vmatmul.msk.f32.gmra.mxu0 %vm198_vm0, %v174_v8  ;;  %1225 = vmatmul.msk.f32.gmra.mxu1 %vm198_vm0, %v174_v8  ;;  %v731_v37 = vmul.f32 %v1327_v28, %v730_v3 }
 0x792   :  { %v145_v12 = vpop.permute.xlu2 %144 }
 0x793   :  { %v155_v15 = vmul.f32 %v1608_v38, %v145_v12  ;;  %v732_v4 = vadd.f32 %v1327_v28, %v731_v37  ;;  %v739_v38 = vand.u32 2147483648, %v712_v24 }
 0x795   :  { %v163_v16 = vadd.f32 %v155_v15, %v113_v11  ;;  %v740_v10 = vor.u32 1.1754944e-38, %v739_v38 }
 0x797   :  { %v175_v19 = vadd.f32 %v1619_v42, %v163_v16  ;;  %v736_v42 = vsel %vm735_vm1, %v1327_v28, %v732_v4 }
 0x798   :  { %v741_v13 = vsel %vm738_vm2, %v740_v10, %v736_v42 }
 0x799   :  { %1218 = vmatmul.msk.f32.gmra.mxu0 %vm198_vm0, %v175_v19  ;;  %1226 = vmatmul.msk.f32.gmra.mxu1 %vm198_vm0, %v175_v19 }
 0x7a8   :  { %v293_v17 = vpop.f32.mrf.mxu1  ;;  %v252_v30 = vpop.f32.mrf.mxu0 }
 0x7a9   :  { %v294_v25 = vadd.f32 %v293_v17, %v1647_v46  ;;  %v253_v35 = vadd.f32 %v252_v30, %v1651_v52 }
 0x7f5   :  { %v758_v14 = vpop.permute.xlu0 %757 }
 0x7f6   :  { %v760_v5 = vmul.f32 %v758_v14, %v741_v13 }
 0x7f8   :  { %1241 = vmatmul.msk.f32.vlgmr.msrb.gmra.mxu0 %vm198_vm0, %v760_v5  ;;  %1242 = vmatmul.msk.f32.vlgmr.msrb.gmra.mxu1 %vm198_vm0, %v760_v5 }
 0x805   :  { %v1812_v18 = vpop.f32.mrf.mxu1  ;;  %v1820_v31 = vpop.f32.mrf.mxu0 }
 0x806   :  { %v297_v24 = vadd.f32 %v1812_v18, %v1647_v46  ;;  %v256_v4 = vadd.f32 %v1820_v31, %v1651_v52 }
 0x80e   :  { %v1814_v21 = vpop.f32.mrf.mxu1  ;;  %v1822_v32 = vpop.f32.mrf.mxu0 }
 0x816   :  { %v1816_v22 = vpop.f32.mrf.mxu1  ;;  %v1824_v33 = vpop.f32.mrf.mxu0 }
 0x875   :  { %v806_v26 = vpop.f32.mrf.mxu1  ;;  %v786_v34 = vpop.f32.mrf.mxu0 }
 0x876   :  { %v810_v29 = vadd.f32 %v806_v26, %v294_v25  ;;  %v809_v36 = vadd.f32 %v786_v34, %v253_v35 }
 0x878   :  { %1328 = vtanh.f32 %v810_v29  ;;  %v1243_v39 = vmul.f32 -1.442695, %v809_v36  ;;  %v1244_v63 = vmul.f32 -1.442695, %v810_v29 }
 0x87a   :  { %1330 = vpow2.f32 %v1243_v39 }
 0x87e   :  { %v1329_v0 = vpop.eup %1328 }
 0x87f   :  { %852 = vrot.lane.b32.xlu1 %v1329_v0, %s1461_s15 }
 0x880   :  { %v1331_v40 = vpop.eup %1330 }
 0x881   :  { %v817_v41 = vadd.f32 1.0, %v1331_v40 }
 0x883   :  { %1332 = vrcp.f32 %v817_v41  ;;  %v830_v50 = vand.u32 2147483648, %v817_v41  ;;  %vm824_vm4 = vweird.f32 %v817_v41  ;;  %v828_v51 = vand.u32 2147483647, %v817_v41 }
 0x885   :  { %v831_v54 = vor.u32 1.1754944e-38, %v830_v50  ;;  %vm829_vm6 = vcmp.eq.f32.partialorder %v828_v51, 8.507059e+37 }
 0x889   :  { %v1333_v43 = vpop.eup %1332 }
 0x88a   :  { %v820_v44 = vmul.f32 %v1333_v43, %v817_v41  ;;  %vm825_vm3 = vweird.f32 %v1333_v43 }
 0x88b   :  { %vm826_vm5 = vmor %vm824_vm4, %vm825_vm3 }
 0x88c   :  { %v821_v45 = vsub.f32 1.0, %v820_v44 }
 0x88e   :  { %v822_v47 = vmul.f32 %v1333_v43, %v821_v45 }
 0x890   :  { %v823_v48 = vadd.f32 %v1333_v43, %v822_v47 }
 0x892   :  { %v827_v53 = vsel %vm826_vm5, %v1333_v43, %v823_v48 }
 0x893   :  { %v832_v58 = vsel %vm829_vm6, %v831_v54, %v827_v53 }
 0x894   :  { %v850_v27 = vmul.f32 %v832_v58, %v1790_v56 }
 0x8f1   :  { %v853_v57 = vpop.permute.xlu1 %852 }
 0x8f2   :  { %v855_v59 = vmul.f32 %v853_v57, %v832_v58 }
 0x8f4   :  { %857 = vrot.lane.b32.xlu2 %v855_v59, %s1461_s15 }
 0x94e   :  { %v858_v60 = vpop.permute.xlu2 %857 }
 0x94f   :  { %v860_v62 = vadd.f32 %v858_v60, %v850_v27 }
 0x951   :  { %1334 = vtanh.f32 %v860_v62 }
 0x952   :  { %1336 = vpow2.f32 %v1244_v63 }
 0x957   :  { %v1335_v6 = vpop.eup %1334 }
 0x958   :  { %863 = vrot.lane.b32.xlu0 %v1335_v6, %s1461_s15  ;;  %v1337_v55 = vpop.eup %1336 }
 0x959   :  { %v818_v1 = vadd.f32 1.0, %v1337_v55 }
 0x95b   :  { %1338 = vrcp.f32 %v818_v1  ;;  %v845_v12 = vand.u32 2147483648, %v818_v1  ;;  %vm839_vm8 = vweird.f32 %v818_v1  ;;  %v843_v56 = vand.u32 2147483647, %v818_v1 }
 0x95d   :  { %v846_v16 = vor.u32 1.1754944e-38, %v845_v12  ;;  %vm844_vm10 = vcmp.eq.f32.partialorder %v843_v56, 8.507059e+37 }
 0x961   :  { %v1339_v49 = vpop.eup %1338 }
 0x962   :  { %v835_v7 = vmul.f32 %v1339_v49, %v818_v1  ;;  %vm840_vm7 = vweird.f32 %v1339_v49 }
 0x963   :  { %vm841_vm9 = vmor %vm839_vm8, %vm840_vm7 }
 0x964   :  { %v836_v61 = vsub.f32 1.0, %v835_v7 }
 0x966   :  { %v837_v8 = vmul.f32 %v1339_v49, %v836_v61 }
 0x968   :  { %v838_v11 = vadd.f32 %v1339_v49, %v837_v8 }
 0x96a   :  { %v842_v15 = vsel %vm841_vm9, %v1339_v49, %v838_v11  ;;  %v259_v49 = vadd.f32 %v1822_v32, %v1651_v52 }
 0x96b   :  { %v847_v19 = vsel %vm844_vm10, %v846_v16, %v842_v15 }
 0x9ca   :  { %v864_v20 = vpop.permute.xlu0 %863 }
 0x9cb   :  { %v866_v23 = vmul.f32 %v864_v20, %v847_v19 }
 0x9cd   :  { %1245 = vmatmul.msk.f32.vlgmr.msra.gmra.mxu2 %vm198_vm0, %v866_v23  ;;  %1246 = vmatmul.msk.f32.vlgmr.msra.gmra.mxu3 %vm198_vm0, %v866_v23 }
 0xa50   :  { %v912_v28 = vpop.f32.mrf.mxu3  ;;  %v892_v37 = vpop.f32.mrf.mxu2 }
 0xa51   :  { %v916_v2 = vadd.f32 %v912_v28, %v297_v24  ;;  %v915_v38 = vadd.f32 %v892_v37, %v256_v4 }
 0xa53   :  { %1340 = vtanh.f32 %v916_v2  ;;  %v1247_v9 = vmul.f32 -1.442695, %v915_v38  ;;  %v1248_v41 = vmul.f32 -1.442695, %v916_v2 }
 0xa55   :  { %1342 = vpow2.f32 %v1247_v9 }
 0xa59   :  { %v1341_v3 = vpop.eup %1340 }
 0xa5a   :  { %958 = vrot.lane.b32.xlu1 %v1341_v3, %s1461_s15 }
 0xa5b   :  { %v1343_v42 = vpop.eup %1342 }
 0xa5c   :  { %v923_v10 = vadd.f32 1.0, %v1343_v42 }
 0xa5e   :  { %1344 = vrcp.f32 %v923_v10  ;;  %v936_v25 = vand.u32 2147483648, %v923_v10  ;;  %vm930_vm12 = vweird.f32 %v923_v10  ;;  %v934_v26 = vand.u32 2147483647, %v923_v10 }
 0xa60   :  { %v937_v0 = vor.u32 1.1754944e-38, %v936_v25  ;;  %vm935_vm14 = vcmp.eq.f32.partialorder %v934_v26, 8.507059e+37 }
 0xa64   :  { %v1345_v13 = vpop.eup %1344 }
 0xa65   :  { %v926_v14 = vmul.f32 %v1345_v13, %v923_v10  ;;  %vm931_vm11 = vweird.f32 %v1345_v13 }
 0xa66   :  { %vm932_vm13 = vmor %vm930_vm12, %vm931_vm11 }
 0xa67   :  { %v927_v5 = vsub.f32 1.0, %v926_v14 }
 0xa69   :  { %v928_v17 = vmul.f32 %v1345_v13, %v927_v5 }
 0xa6b   :  { %v929_v18 = vadd.f32 %v1345_v13, %v928_v17 }
 0xa6d   :  { %v933_v29 = vsel %vm932_vm13, %v1345_v13, %v929_v18 }
 0xa6e   :  { %v938_v31 = vsel %vm935_vm14, %v937_v0, %v933_v29 }
 0xa6f   :  { %v956_v35 = vmul.f32 %v938_v31, %v860_v62  ;;  %v300_v62 = vadd.f32 %v1814_v21, %v1647_v46 }
 0xacc   :  { %v959_v30 = vpop.permute.xlu1 %958 }
 0xacd   :  { %v961_v34 = vmul.f32 %v959_v30, %v938_v31 }
 0xacf   :  { %963 = vrot.lane.b32.xlu2 %v961_v34, %s1461_s15 }
 0xb29   :  { %v964_v36 = vpop.permute.xlu2 %963 }
 0xb2a   :  { %v966_v39 = vadd.f32 %v964_v36, %v956_v35  ;;  %v303_v35 = vadd.f32 %v1816_v22, %v1647_v46 }
 0xb2c   :  { %1346 = vtanh.f32 %v966_v39 }
 0xb2d   :  { %1348 = vpow2.f32 %v1248_v41 }
 0xb32   :  { %v1347_v40 = vpop.eup %1346 }
 0xb33   :  { %969 = vrot.lane.b32.xlu0 %v1347_v40, %s1461_s15  ;;  %v1349_v43 = vpop.eup %1348 }
 0xb34   :  { %v924_v44 = vadd.f32 1.0, %v1349_v43  ;;  %v262_v43 = vadd.f32 %v1824_v33, %v1651_v52 }
 0xb36   :  { %1350 = vrcp.f32 %v924_v44  ;;  %v951_v53 = vand.u32 2147483648, %v924_v44  ;;  %vm945_vm1 = vweird.f32 %v924_v44  ;;  %v949_v54 = vand.u32 2147483647, %v924_v44 }
 0xb38   :  { %v952_v58 = vor.u32 1.1754944e-38, %v951_v53  ;;  %vm950_vm3 = vcmp.eq.f32.partialorder %v949_v54, 8.507059e+37 }
 0xb3c   :  { %v1351_v45 = vpop.eup %1350 }
 0xb3d   :  { %v941_v47 = vmul.f32 %v1351_v45, %v924_v44  ;;  %vm946_vm15 = vweird.f32 %v1351_v45 }
 0xb3e   :  { %vm947_vm2 = vmor %vm945_vm1, %vm946_vm15 }
 0xb3f   :  { %v942_v48 = vsub.f32 1.0, %v941_v47 }
 0xb41   :  { %v943_v50 = vmul.f32 %v1351_v45, %v942_v48 }
 0xb43   :  { %v944_v51 = vadd.f32 %v1351_v45, %v943_v50 }
 0xb45   :  { %v948_v57 = vsel %vm947_vm2, %v1351_v45, %v944_v51 }
 0xb46   :  { %v953_v59 = vsel %vm950_vm3, %v952_v58, %v948_v57 }
 0xba5   :  { %v970_v27 = vpop.permute.xlu0 %969 }
 0xba6   :  { %v972_v60 = vmul.f32 %v970_v27, %v953_v59 }
 0xba8   :  { %1249 = vmatmul.msk.f32.vlgmr.msra.gmra.mxu0 %vm198_vm0, %v972_v60  ;;  %1250 = vmatmul.msk.f32.vlgmr.msra.gmra.mxu1 %vm198_vm0, %v972_v60 }
 0xc25   :  { %v1018_v6 = vpop.f32.mrf.mxu1  ;;  %v998_v1 = vpop.f32.mrf.mxu0 }
 0xc26   :  { %v1022_v63 = vadd.f32 %v1018_v6, %v300_v62  ;;  %v1021_v7 = vadd.f32 %v998_v1, %v259_v49 }
 0xc28   :  { %1352 = vtanh.f32 %v1022_v63  ;;  %v1251_v61 = vmul.f32 -1.442695, %v1021_v7  ;;  %v1252_v9 = vmul.f32 -1.442695, %v1022_v63 }
 0xc2a   :  { %1354 = vpow2.f32 %v1251_v61 }
 0xc2e   :  { %v1353_v55 = vpop.eup %1352 }
 0xc2f   :  { %1064 = vrot.lane.b32.xlu1 %v1353_v55, %s1461_s15 }
 0xc30   :  { %v1355_v8 = vpop.eup %1354 }
 0xc31   :  { %v1029_v11 = vadd.f32 1.0, %v1355_v8 }
 0xc33   :  { %1356 = vrcp.f32 %v1029_v11  ;;  %v1042_v19 = vand.u32 2147483648, %v1029_v11  ;;  %vm1036_vm5 = vweird.f32 %v1029_v11  ;;  %v1040_v20 = vand.u32 2147483647, %v1029_v11 }
 0xc35   :  { %v1043_v24 = vor.u32 1.1754944e-38, %v1042_v19  ;;  %vm1041_vm7 = vcmp.eq.f32.partialorder %v1040_v20, 8.507059e+37 }
 0xc39   :  { %v1357_v12 = vpop.eup %1356 }
 0xc3a   :  { %v1032_v56 = vmul.f32 %v1357_v12, %v1029_v11  ;;  %vm1037_vm4 = vweird.f32 %v1357_v12 }
 0xc3b   :  { %vm1038_vm6 = vmor %vm1036_vm5, %vm1037_vm4 }
 0xc3c   :  { %v1033_v15 = vsub.f32 1.0, %v1032_v56 }
 0xc3e   :  { %v1034_v21 = vmul.f32 %v1357_v12, %v1033_v15 }
 0xc40   :  { %v1035_v16 = vadd.f32 %v1357_v12, %v1034_v21 }
 0xc42   :  { %v1039_v23 = vsel %vm1038_vm6, %v1357_v12, %v1035_v16 }
 0xc43   :  { %v1044_v28 = vsel %vm1041_vm7, %v1043_v24, %v1039_v23 }
 0xc44   :  { %v1062_v3 = vmul.f32 %v1044_v28, %v966_v39 }
 0xca1   :  { %v1065_v32 = vpop.permute.xlu1 %1064 }
 0xca2   :  { %v1067_v2 = vmul.f32 %v1065_v32, %v1044_v28 }
 0xca4   :  { %1069 = vrot.lane.b32.xlu2 %v1067_v2, %s1461_s15 }
 0xcfe   :  { %v1070_v37 = vpop.permute.xlu2 %1069 }
 0xcff   :  { %v1072_v4 = vadd.f32 %v1070_v37, %v1062_v3 }
 0xd01   :  { %1358 = vtanh.f32 %v1072_v4 }
 0xd02   :  { %1360 = vpow2.f32 %v1252_v9 }
 0xd07   :  { %v1359_v38 = vpop.eup %1358 }
 0xd08   :  { %1075 = vrot.lane.b32.xlu0 %v1359_v38, %s1461_s15  ;;  %v1361_v42 = vpop.eup %1360 }
 0xd09   :  { %v1030_v10 = vadd.f32 1.0, %v1361_v42 }
 0xd0b   :  { %1362 = vrcp.f32 %v1030_v10  ;;  %v1057_v25 = vand.u32 2147483648, %v1030_v10  ;;  %vm1051_vm9 = vweird.f32 %v1030_v10  ;;  %v1055_v26 = vand.u32 2147483647, %v1030_v10 }
 0xd0d   :  { %v1058_v0 = vor.u32 1.1754944e-38, %v1057_v25  ;;  %vm1056_vm11 = vcmp.eq.f32.partialorder %v1055_v26, 8.507059e+37 }
 0xd11   :  { %v1363_v13 = vpop.eup %1362 }
 0xd12   :  { %v1047_v14 = vmul.f32 %v1363_v13, %v1030_v10  ;;  %vm1052_vm8 = vweird.f32 %v1363_v13 }
 0xd13   :  { %vm1053_vm10 = vmor %vm1051_vm9, %vm1052_vm8 }
 0xd14   :  { %v1048_v5 = vsub.f32 1.0, %v1047_v14 }
 0xd16   :  { %v1049_v17 = vmul.f32 %v1363_v13, %v1048_v5 }
 0xd18   :  { %v1050_v18 = vadd.f32 %v1363_v13, %v1049_v17 }
 0xd1a   :  { %v1054_v29 = vsel %vm1053_vm10, %v1363_v13, %v1050_v18 }
 0xd1b   :  { %v1059_v30 = vsel %vm1056_vm11, %v1058_v0, %v1054_v29 }
 0xd7a   :  { %v1076_v31 = vpop.permute.xlu0 %1075 }
 0xd7b   :  { %v1078_v34 = vmul.f32 %v1076_v31, %v1059_v30 }
 0xd7d   :  { %1253 = vmatmul.msk.f32.vlgmr.msrb.gmra.mxu2 %vm198_vm0, %v1078_v34  ;;  %1254 = vmatmul.msk.f32.vlgmr.msrb.gmra.mxu3 %vm198_vm0, %v1078_v34 }
 0xe00   :  { %v1124_v36 = vpop.f32.mrf.mxu3  ;;  %v1104_v41 = vpop.f32.mrf.mxu2 }
 0xe01   :  { %v1128_v39 = vadd.f32 %v1124_v36, %v303_v35  ;;  %v1127_v44 = vadd.f32 %v1104_v41, %v262_v43 }
 0xe03   :  { %1364 = vtanh.f32 %v1128_v39  ;;  %v1255_v45 = vmul.f32 -1.442695, %v1127_v44  ;;  %v1256_v55 = vmul.f32 -1.442695, %v1128_v39 }
 0xe05   :  { %1366 = vpow2.f32 %v1255_v45 }
 0xe09   :  { %v1365_v40 = vpop.eup %1364 }
 0xe0a   :  { %1170 = vrot.lane.b32.xlu1 %v1365_v40, %s1461_s15 }
 0xe0b   :  { %v1367_v47 = vpop.eup %1366 }
 0xe0c   :  { %v1135_v48 = vadd.f32 1.0, %v1367_v47 }
 0xe0e   :  { %1368 = vrcp.f32 %v1135_v48  ;;  %v1148_v54 = vand.u32 2147483648, %v1135_v48  ;;  %vm1142_vm13 = vweird.f32 %v1135_v48  ;;  %v1146_v57 = vand.u32 2147483647, %v1135_v48 }
 0xe10   :  { %v1149_v59 = vor.u32 1.1754944e-38, %v1148_v54  ;;  %vm1147_vm15 = vcmp.eq.f32.partialorder %v1146_v57, 8.507059e+37 }
 0xe14   :  { %v1369_v50 = vpop.eup %1368 }
 0xe15   :  { %v1138_v51 = vmul.f32 %v1369_v50, %v1135_v48  ;;  %vm1143_vm12 = vweird.f32 %v1369_v50 }
 0xe16   :  { %vm1144_vm14 = vmor %vm1142_vm13, %vm1143_vm12 }
 0xe17   :  { %v1139_v53 = vsub.f32 1.0, %v1138_v51 }
 0xe19   :  { %v1140_v46 = vmul.f32 %v1369_v50, %v1139_v53 }
 0xe1b   :  { %v1141_v22 = vadd.f32 %v1369_v50, %v1140_v46 }
 0xe1d   :  { %v1145_v58 = vsel %vm1144_vm14, %v1369_v50, %v1141_v22 }
 0xe1e   :  { %v1150_v33 = vsel %vm1147_vm15, %v1149_v59, %v1145_v58 }
 0xe1f   :  { %v1168_v60 = vmul.f32 %v1150_v33, %v1072_v4 }
 0xe7c   :  { %v1171_v52 = vpop.permute.xlu1 %1170 }
 0xe7d   :  { %v1173_v27 = vmul.f32 %v1171_v52, %v1150_v33 }
 0xe7f   :  { %1175 = vrot.lane.b32.xlu2 %v1173_v27, %s1461_s15 }
 0xed9   :  { %v1176_v62 = vpop.permute.xlu2 %1175 }
 0xeda   :  { %v1178_v6 = vadd.f32 %v1176_v62, %v1168_v60 }
 0xedc   :  { %1370 = vtanh.f32 %v1178_v6 }
 0xedd   :  { %1372 = vpow2.f32 %v1256_v55 }
 0xee2   :  { %v1371_v63 = vpop.eup %1370 }
 0xee3   :  { %1181 = vrot.lane.b32.xlu0 %v1371_v63, %s1461_s15  ;;  %v1373_v1 = vpop.eup %1372 }
 0xee4   :  { %v1136_v49 = vadd.f32 1.0, %v1373_v1 }
 0xee6   :  { %1374 = vrcp.f32 %v1136_v49  ;;  %v1163_v56 = vand.u32 2147483648, %v1136_v49  ;;  %vm1157_vm2 = vweird.f32 %v1136_v49  ;;  %v1161_v15 = vand.u32 2147483647, %v1136_v49 }
 0xee8   :  { %v1164_v16 = vor.u32 1.1754944e-38, %v1163_v56  ;;  %vm1162_vm4 = vcmp.eq.f32.partialorder %v1161_v15, 8.507059e+37 }
 0xeec   :  { %v1375_v7 = vpop.eup %1374 }
 0xeed   :  { %v1153_v61 = vmul.f32 %v1375_v7, %v1136_v49  ;;  %vm1158_vm1 = vweird.f32 %v1375_v7 }
 0xeee   :  { %vm1159_vm3 = vmor %vm1157_vm2, %vm1158_vm1 }
 0xeef   :  { %v1154_v8 = vsub.f32 1.0, %v1153_v61 }
 0xef1   :  { %v1155_v11 = vmul.f32 %v1375_v7, %v1154_v8 }
 0xef3   :  { %v1156_v12 = vadd.f32 %v1375_v7, %v1155_v11 }
 0xef5   :  { %v1160_v21 = vsel %vm1159_vm3, %v1375_v7, %v1156_v12 }
 0xef6   :  { %v1165_v19 = vsel %vm1162_vm4, %v1164_v16, %v1160_v21 }
 0xf55   :  { %v1182_v20 = vpop.permute.xlu0 %1181 }
 0xf56   :  { %v1184_v23 = vmul.f32 %v1182_v20, %v1165_v19 }
 0xf58   :  { %1185 = vst.msk [vmem:[#allocation8] sm:$0xff] %vm198_vm0, %v1184_v23 }
 0xf59   :  { %1196 = dma.vmem_to_hbm [thread:$0]  %s1192_s29, 128, %s1194_s8, [#allocation5]  }
 0xf5a   :  { %1452 = dma.done.wait [#allocation5], 128  }
 0xf5b   :  { %1453 = vsyncadd [#allocation5], 4294967168 }
 0xf5c   :  { %1201 = vsyncpa [#allocation4], 1 }
 0xf5d   :  { %1202 = vsyncpa [#allocation7], 1 }
 0xf5e   :  { %1203 = vsyncpa [#allocation5], 1 }

</bundles_post_ra>
